<compile_context>
chip_gen: v6e
topology: v6e:2x2x1
jax: 0.10.0
libtpu: 0.0.40
codegen_flags: <defaults>
</compile_context>

<pallas_src>
import functools

import jax
import jax.numpy as jnp
import numpy as np
from jax import lax
from jax.experimental import pallas as pl
from jax.experimental.pallas import tpu as pltpu

EPS = 1e-5
NEG_INF = -1e9

# Row layout of the packed bias / LayerNorm vector slab (cols [0:d] except b1 = mlp width).
VEC_ROWS = {
    "ca_bq": 0, "ca_bk": 1, "ca_bv": 2, "ca_bo": 3, "ca_g": 4, "ca_b": 5,
    "sa_bq": 6, "sa_bk": 7, "sa_bv": 8, "sa_bo": 9, "sa_g": 10, "sa_b": 11,
    "b2": 12, "f_g": 13, "f_b": 14, "b1": 15,
}


def _layer_norm(x, gamma, beta):
    mu = jnp.mean(x, axis=-1, keepdims=True)
    xc = x - mu
    var = jnp.mean(xc * xc, axis=-1, keepdims=True)
    return xc * jax.lax.rsqrt(var + EPS) * gamma + beta


def decoder_block_kernel(*refs, num_heads, d, mlp_dim, has_mask):
    (scene_ref, clicks_ref, scene_pe_ref, clicks_pe_ref,
     sb_row_ref, cb_col_ref, cb_row_ref) = refs[:7]
    i = 7
    if has_mask:
        user_mask_ref = refs[i]
        i += 1
    (ca_w_ref, sa_w_ref, w1_ref, w2_ref, vecs_ref,
     clicks_out_ref, m_scr, l_scr, acc_scr, q_scr) = refs[i:i + 10]

    t = pl.program_id(0)
    n_t = pl.num_programs(0)
    nh = num_heads
    hd = d // nh
    n_clk = clicks_ref.shape[0]
    R = nh * n_clk

    vecs = vecs_ref[...]                                   # (16, width) f32

    def vec(name, width=d):
        r = VEC_ROWS[name]
        return vecs[r:r + 1, :width]

    def head_mask():
        # head_mask[r, c] = 1 iff lane c belongs to the head of row-block r.
        row_head = lax.broadcasted_iota(jnp.int32, (nh, n_clk, d), 0).reshape(R, d)
        lane = lax.broadcasted_iota(jnp.int32, (R, d), 1)
        lo = row_head * hd
        return jnp.logical_and(lane >= lo, lane < lo + hd).astype(jnp.float32)

    def stack_rows(x):
        n, c = x.shape
        return jnp.broadcast_to(x[None, :, :], (nh, n, c)).reshape(nh * n, c)

    cb_col = cb_col_ref[...]                               # (n_clk, 1) int32

    # ---- init + cross-attention Q projection on the first scene tile ----------------------
    @pl.when(t == 0)
    def _():
        m_scr[...] = jnp.full_like(m_scr, -1e30)
        l_scr[...] = jnp.zeros_like(l_scr)
        acc_scr[...] = jnp.zeros_like(acc_scr)
        q_in = (clicks_ref[...] + clicks_pe_ref[...]).astype(jnp.bfloat16)
        # 1/sqrt(head_dim) is already folded into the q weight/bias at pack time.
        q = jnp.dot(q_in, ca_w_ref[...][:, 0:d],
                    preferred_element_type=jnp.float32) + vec("ca_bq")
        q_scr[...] = (stack_rows(q) * head_mask()).astype(jnp.bfloat16)

    # ---- per-tile online softmax over scene points (flash-style) --------------------------
    scene_bf = scene_ref[...]                              # (T, d) bf16
    ca_w = ca_w_ref[...]                                   # (d, 4d) bf16
    k = jnp.dot(scene_bf + scene_pe_ref[...], ca_w[:, d:2 * d],
                preferred_element_type=jnp.float32) + vec("ca_bk")
    v = jnp.dot(scene_bf, ca_w[:, 2 * d:3 * d],
                preferred_element_type=jnp.float32) + vec("ca_bv")

    logits = lax.dot_general(q_scr[...], k.astype(jnp.bfloat16),
                             (((1,), (1,)), ((), ())),
                             preferred_element_type=jnp.float32)        # (R, T)
    T = logits.shape[1]
    cross_add = jnp.where(cb_col != sb_row_ref[...],
                          jnp.float32(NEG_INF), jnp.float32(0.0))       # (n_clk, T)
    if has_mask:
        cross_add = jnp.where(user_mask_ref[...] > 0.5, jnp.float32(NEG_INF), cross_add)
    # Mask added via a head-broadcast view -> never materialized num_heads x in HBM/VMEM.
    logits = (logits.reshape(nh, n_clk, T) + cross_add[None, :, :]).reshape(R, T)

    m_old = m_scr[...]
    m_new = jnp.maximum(m_old, jnp.max(logits, axis=-1, keepdims=True))
    alpha = jnp.exp(m_old - m_new)
    p = jnp.exp(logits - m_new)
    l_scr[...] = alpha * l_scr[...] + jnp.sum(p, axis=-1, keepdims=True)
    acc_scr[...] = alpha * acc_scr[...] + jnp.dot(p.astype(jnp.bfloat16),
                                                  v.astype(jnp.bfloat16),
                                                  preferred_element_type=jnp.float32)
    m_scr[...] = m_new

    # ---- finalize on the last tile: cross-attn output, self-attn, FFN ---------------------
    @pl.when(t == n_t - 1)
    def _():
        hm = head_mask()
        clicks_f32 = clicks_ref[...]
        clicks_pe_f32 = clicks_pe_ref[...]

        ctx = acc_scr[...] * hm * pl.reciprocal(l_scr[...], approx=True)   # (R, d)
        ctx = ctx.reshape(nh, n_clk, d)
        o = ctx[0]
        for h in range(1, nh):                                             # static, tiny
            o = o + ctx[h]
        attn_out = jnp.dot(o.astype(jnp.bfloat16), ca_w[:, 3 * d:4 * d],
                           preferred_element_type=jnp.float32) + vec("ca_bo")
        clicks1 = _layer_norm(clicks_f32 + attn_out, vec("ca_g"), vec("ca_b"))

        # ---- click -> click self attention (small, full) ----
        self_add = jnp.where(cb_col != cb_row_ref[...],
                             jnp.float32(NEG_INF), jnp.float32(0.0))       # (n_clk, n_clk)
        sa_w = sa_w_ref[...]
        qk_in = (clicks1 + clicks_pe_f32).astype(jnp.bfloat16)
        qk = jnp.dot(qk_in, sa_w[:, 0:2 * d], preferred_element_type=jnp.float32)  # fused Q|K
        q2 = qk[:, 0:d] + vec("sa_bq")
        k2 = qk[:, d:2 * d] + vec("sa_bk")
        v2 = jnp.dot(clicks1.astype(jnp.bfloat16), sa_w[:, 2 * d:3 * d],
                     preferred_element_type=jnp.float32) + vec("sa_bv")
        q_stack = (stack_rows(q2) * hm).astype(jnp.bfloat16)
        logits2 = lax.dot_general(q_stack, k2.astype(jnp.bfloat16),
                                  (((1,), (1,)), ((), ())),
                                  preferred_element_type=jnp.float32)      # (R, n_clk)
        logits2 = (logits2.reshape(nh, n_clk, n_clk) + self_add[None, :, :]).reshape(R, n_clk)
        m2 = jnp.max(logits2, axis=-1, keepdims=True)
        p2 = jnp.exp(logits2 - m2)
        attn2 = p2 * pl.reciprocal(jnp.sum(p2, axis=-1, keepdims=True), approx=True)
        ctx2 = jnp.dot(attn2.astype(jnp.bfloat16), v2.astype(jnp.bfloat16),
                       preferred_element_type=jnp.float32)
        ctx2 = (ctx2 * hm).reshape(nh, n_clk, d)
        o2 = ctx2[0]
        for h in range(1, nh):
            o2 = o2 + ctx2[h]
        attn_out2 = jnp.dot(o2.astype(jnp.bfloat16), sa_w[:, 3 * d:4 * d],
                            preferred_element_type=jnp.float32) + vec("sa_bo")
        clicks2 = _layer_norm(clicks1 + attn_out2, vec("sa_g"), vec("sa_b"))

        # ---- FFN ----
        h1 = jnp.dot(clicks2.astype(jnp.bfloat16), w1_ref[...],
                     preferred_element_type=jnp.float32) + vec("b1", mlp_dim)
        h1 = jnp.maximum(h1, jnp.float32(0.0))
        ff = jnp.dot(h1.astype(jnp.bfloat16), w2_ref[...],
                     preferred_element_type=jnp.float32) + vec("b2")
        clicks_out_ref[...] = _layer_norm(clicks2 + ff, vec("f_g"), vec("f_b"))


def pack_params(params, num_heads):
    """One-time packing of the 26 module parameters into 5 DMA-friendly bf16/f32 slabs."""
    d = params["ca_wq"].shape[0]
    mlp_dim = params["w1"].shape[1]
    width = max(d, mlp_dim)
    hd = d // num_heads
    scale = 1.0 / float(hd) ** 0.5
    bf16 = jnp.bfloat16
    # 1/sqrt(head_dim) folded into the Q weight/bias (one fewer VPU multiply + constant).
    ca_w = jnp.concatenate([params["ca_wq"] * scale, params["ca_wk"],
                            params["ca_wv"], params["ca_wo"]], axis=1).astype(bf16)
    sa_w = jnp.concatenate([params["sa_wq"] * scale, params["sa_wk"],
                            params["sa_wv"], params["sa_wo"]], axis=1).astype(bf16)
    w1 = params["w1"].astype(bf16)
    w2 = params["w2"].astype(bf16)
    n_rows = ((len(VEC_ROWS) + 7) // 8) * 8
    vecs = jnp.zeros((n_rows, width), jnp.float32)
    for name, r in VEC_ROWS.items():
        vv = params[name].astype(jnp.float32).reshape(-1)
        if name in ("ca_bq", "sa_bq"):
            vv = vv * scale
        vecs = vecs.at[r, :vv.shape[0]].set(vv)
    return {"ca_w": ca_w, "sa_w": sa_w, "w1": w1, "w2": w2, "vecs": vecs,
            "d": d, "mlp_dim": mlp_dim, "num_heads": num_heads}


def agile3d_decoder_block(scene, clicks, scene_pe, clicks_pe,
                          scene_batch, clicks_batch, packed,
                          attn_mask=None, num_heads=4, tile_pts=128):
    """Wrapper: scene streamed tile-by-tile over the grid; clicks / weights resident in VMEM."""
    assert tile_pts % 128 == 0, "scene tile must be lane-aligned (multiple of 128 rows)"
    n_pts, d = scene.shape
    n_clk = clicks.shape[0]
    mlp_dim = packed["mlp_dim"]
    width = packed["vecs"].shape[1]
    has_mask = attn_mask is not None

    # Pad the point axis to a multiple of tile_pts; padded points get batch id -1 so the
    # batch-restriction mask removes them from every click's softmax.
    n_pad = ((n_pts + tile_pts - 1) // tile_pts) * tile_pts
    pad = n_pad - n_pts
    scene_bf = jnp.pad(scene.astype(jnp.bfloat16), ((0, pad), (0, 0)))
    scene_pe_bf = jnp.pad(scene_pe.astype(jnp.bfloat16), ((0, pad), (0, 0)))
    sb_row = jnp.pad(scene_batch.astype(jnp.int32), (0, pad),
                     constant_values=-1).reshape(1, n_pad)
    cb_col = clicks_batch.astype(jnp.int32).reshape(n_clk, 1)
    cb_row = clicks_batch.astype(jnp.int32).reshape(1, n_clk)

    inputs = [scene_bf, clicks.astype(jnp.float32),
              scene_pe_bf, clicks_pe.astype(jnp.float32),
              sb_row, cb_col, cb_row]
    in_specs = [
        pl.BlockSpec((tile_pts, d), lambda t: (t, 0)),    # scene (streamed)
        pl.BlockSpec((n_clk, d), lambda t: (0, 0)),       # clicks (resident)
        pl.BlockSpec((tile_pts, d), lambda t: (t, 0)),    # scene_pe (streamed)
        pl.BlockSpec((n_clk, d), lambda t: (0, 0)),       # clicks_pe
        pl.BlockSpec((1, tile_pts), lambda t: (0, t)),    # scene batch ids (streamed)
        pl.BlockSpec((n_clk, 1), lambda t: (0, 0)),       # clicks batch ids (col)
        pl.BlockSpec((1, n_clk), lambda t: (0, 0)),       # clicks batch ids (row)
    ]
    if has_mask:
        inputs.append(jnp.pad(attn_mask.astype(jnp.float32), ((0, 0), (0, pad))))
        in_specs.append(pl.BlockSpec((n_clk, tile_pts), lambda t: (0, t)))
    inputs += [packed["ca_w"], packed["sa_w"], packed["w1"], packed["w2"], packed["vecs"]]
    in_specs += [
        pl.BlockSpec((d, 4 * d), lambda t: (0, 0)),
        pl.BlockSpec((d, 4 * d), lambda t: (0, 0)),
        pl.BlockSpec((d, mlp_dim), lambda t: (0, 0)),
        pl.BlockSpec((mlp_dim, d), lambda t: (0, 0)),
        pl.BlockSpec((packed["vecs"].shape[0], width), lambda t: (0, 0)),
    ]

    R = num_heads * n_clk
    clicks_out = pl.pallas_call(
        functools.partial(decoder_block_kernel, num_heads=num_heads,
                          d=d, mlp_dim=mlp_dim, has_mask=has_mask),
        grid=(n_pad // tile_pts,),
        in_specs=in_specs,
        out_specs=pl.BlockSpec((n_clk, d), lambda t: (0, 0)),
        out_shape=jax.ShapeDtypeStruct((n_clk, d), jnp.float32),
        scratch_shapes=[
            pltpu.VMEM((R, 1), jnp.float32),      # running max  m
            pltpu.VMEM((R, 1), jnp.float32),      # running sum  l
            pltpu.VMEM((R, d), jnp.float32),      # running ctx  acc
            pltpu.VMEM((R, d), jnp.bfloat16),     # masked+scaled Q (stacked heads)
        ],
        compiler_params=pltpu.CompilerParams(
            dimension_semantics=("arbitrary",),
            vmem_limit_bytes=32 * 1024 * 1024),
    )(*inputs)
    # scene is unchanged by the module; return the input (no HBM round-trip).
    return scene, clicks_out


# ---------------------------------------------------------------------------------------
# Pure-JAX reference (per-head formulation, exact f32 softmax) for correctness checking.
# ---------------------------------------------------------------------------------------
def _reference_block(scene, clicks, scene_pe, clicks_pe, scene_batch, clicks_batch,
                     params, attn_mask, num_heads):
    d = scene.shape[1]
    hd = d // num_heads
    scale = 1.0 / float(hd) ** 0.5

    def mha(q_in, k_in, v_in, add, wq, bq, wk, bk, wv, bv, wo, bo):
        q = q_in @ wq + bq
        k = k_in @ wk + bk
        v = v_in @ wv + bv
        outs = []
        for h in range(num_heads):
            sl = slice(h * hd, (h + 1) * hd)
            logits = (q[:, sl] @ k[:, sl].T) * scale + add
            p = jax.nn.softmax(logits, axis=-1)
            outs.append(p @ v[:, sl])
        return jnp.concatenate(outs, axis=-1) @ wo + bo

    def ln(x, g, b):
        mu = x.mean(-1, keepdims=True)
        var = ((x - mu) ** 2).mean(-1, keepdims=True)
        return (x - mu) * jax.lax.rsqrt(var + EPS) * g + b

    sb = scene_batch.reshape(1, -1)
    cbc = clicks_batch.reshape(-1, 1)
    cbr = clicks_batch.reshape(1, -1)
    cross_add = jnp.where(cbc != sb, NEG_INF, 0.0)
    if attn_mask is not None:
        cross_add = jnp.where(attn_mask > 0.5, NEG_INF, cross_add)
    self_add = jnp.where(cbc != cbr, NEG_INF, 0.0)

    p = params
    x = mha(clicks + clicks_pe, scene + scene_pe, scene, cross_add,
            p["ca_wq"], p["ca_bq"], p["ca_wk"], p["ca_bk"],
            p["ca_wv"], p["ca_bv"], p["ca_wo"], p["ca_bo"])
    clicks = ln(clicks + x, p["ca_g"], p["ca_b"])
    x = mha(clicks + clicks_pe, clicks + clicks_pe, clicks, self_add,
            p["sa_wq"], p["sa_bq"], p["sa_wk"], p["sa_bk"],
            p["sa_wv"], p["sa_bv"], p["sa_wo"], p["sa_bo"])
    clicks = ln(clicks + x, p["sa_g"], p["sa_b"])
    h = jnp.maximum(clicks @ p["w1"] + p["b1"], 0.0)
    clicks = ln(clicks + h @ p["w2"] + p["b2"], p["f_g"], p["f_b"])
    return scene, clicks


def init_params(key, d, mlp_dim):
    """Deterministic synthetic parameter init (shapes mirror the PyTorch module)."""
    keys = jax.random.split(key, 16)
    ki = iter(keys)

    def w(shape):
        return jax.random.normal(next(ki), shape, jnp.float32) * 0.02

    params = {}
    for prefix in ("ca", "sa"):
        params[f"{prefix}_wq"] = w((d, d))
        params[f"{prefix}_bq"] = jnp.zeros((1, d), jnp.float32)
        params[f"{prefix}_wk"] = w((d, d))
        params[f"{prefix}_bk"] = jnp.zeros((1, d), jnp.float32)
        params[f"{prefix}_wv"] = w((d, d))
        params[f"{prefix}_bv"] = jnp.zeros((1, d), jnp.float32)
        params[f"{prefix}_wo"] = w((d, d))
        params[f"{prefix}_bo"] = jnp.zeros((1, d), jnp.float32)
        params[f"{prefix}_g"] = jnp.ones((1, d), jnp.float32)
        params[f"{prefix}_b"] = jnp.zeros((1, d), jnp.float32)
    params["w1"] = w((d, mlp_dim))
    params["b1"] = jnp.zeros((1, mlp_dim), jnp.float32)
    params["w2"] = w((mlp_dim, d))
    params["b2"] = jnp.zeros((1, d), jnp.float32)
    params["f_g"] = jnp.ones((1, d), jnp.float32)
    params["f_b"] = jnp.zeros((1, d), jnp.float32)
    return params


if __name__ == "__main__":
    N_POINTS, N_CLICKS, EMBED_DIM, NUM_HEADS, MLP_DIM = 256, 16, 32, 4, 64
    TILE_PTS = 128   # 2 scene tiles -> exercises the online-softmax path

    key = jax.random.PRNGKey(0)
    k_scene, k_clicks, k_spe, k_cpe, k_param, k_mask = jax.random.split(key, 6)

    scene = jax.random.normal(k_scene, (N_POINTS, EMBED_DIM), jnp.float32)
    clicks = jax.random.normal(k_clicks, (N_CLICKS, EMBED_DIM), jnp.float32)
    scene_pe = jax.random.normal(k_spe, (N_POINTS, EMBED_DIM), jnp.float32)
    clicks_pe = jax.random.normal(k_cpe, (N_CLICKS, EMBED_DIM), jnp.float32)
    scene_batch = jnp.concatenate([jnp.zeros(N_POINTS // 2, jnp.int32),
                                   jnp.ones(N_POINTS // 2, jnp.int32)])
    clicks_batch = jnp.concatenate([jnp.zeros(N_CLICKS // 2, jnp.int32),
                                    jnp.ones(N_CLICKS // 2, jnp.int32)])

    params = init_params(k_param, EMBED_DIM, MLP_DIM)
    packed = pack_params(params, NUM_HEADS)

    # --- test 1: no attn_mask, n_pts multiple of tile (2-tile online softmax) -------------
    scene_out, clicks_out = agile3d_decoder_block(
        scene, clicks, scene_pe, clicks_pe, scene_batch, clicks_batch, packed,
        attn_mask=None, num_heads=NUM_HEADS, tile_pts=TILE_PTS)
    jax.block_until_ready(clicks_out)

    ref_scene, ref_clicks = _reference_block(scene, clicks, scene_pe, clicks_pe,
                                             scene_batch, clicks_batch, params,
                                             None, NUM_HEADS)
    assert np.allclose(np.asarray(clicks_out), np.asarray(ref_clicks), atol=2e-2, rtol=2e-2)
    assert np.allclose(np.asarray(scene_out), np.asarray(ref_scene))
    assert not np.any(np.isnan(np.asarray(clicks_out)))

    # --- test 2: attn_mask present AND n_pts not a multiple of the tile (padding path) ----
    N2 = 200
    scene2 = scene[:N2]
    scene_pe2 = scene_pe[:N2]
    scene_batch2 = scene_batch[:N2]
    attn_mask = (jax.random.uniform(k_mask, (N_CLICKS, N2)) < 0.3).astype(jnp.float32)

    _, clicks_out_m = agile3d_decoder_block(
        scene2, clicks, scene_pe2, clicks_pe, scene_batch2, clicks_batch, packed,
        attn_mask=attn_mask, num_heads=NUM_HEADS, tile_pts=TILE_PTS)
    jax.block_until_ready(clicks_out_m)
    _, ref_clicks_m = _reference_block(scene2, clicks, scene_pe2, clicks_pe,
                                       scene_batch2, clicks_batch, params,
                                       attn_mask, NUM_HEADS)
    assert np.allclose(np.asarray(clicks_out_m), np.asarray(ref_clicks_m), atol=2e-2, rtol=2e-2)
    assert not np.any(np.isnan(np.asarray(clicks_out_m)))

    print("KERNEL_OK")
</pallas_src>

<mosaic_0001>
module attributes {stable_mosaic.version = 11 : i64} {
  func.func @decoder_block_kernel(%arg0: i32, %arg1: memref<128x32xbf16, #tpu.memory_space<vmem>>, %arg2: memref<16x32xf32, #tpu.memory_space<vmem>>, %arg3: memref<128x32xbf16, #tpu.memory_space<vmem>>, %arg4: memref<16x32xf32, #tpu.memory_space<vmem>>, %arg5: memref<1x128xi32, #tpu.memory_space<vmem>>, %arg6: memref<16x1xi32, #tpu.memory_space<vmem>>, %arg7: memref<1x16xi32, #tpu.memory_space<vmem>>, %arg8: memref<32x128xbf16, #tpu.memory_space<vmem>>, %arg9: memref<32x128xbf16, #tpu.memory_space<vmem>>, %arg10: memref<32x64xbf16, #tpu.memory_space<vmem>>, %arg11: memref<64x32xbf16, #tpu.memory_space<vmem>>, %arg12: memref<16x64xf32, #tpu.memory_space<vmem>>, %arg13: memref<16x32xf32, #tpu.memory_space<vmem>>, %arg14: memref<64x1xf32, #tpu.memory_space<vmem>>, %arg15: memref<64x1xf32, #tpu.memory_space<vmem>>, %arg16: memref<64x32xf32, #tpu.memory_space<vmem>>, %arg17: memref<64x32xbf16, #tpu.memory_space<vmem>>) attributes {dimension_semantics = [#tpu.dimension_semantics<arbitrary>], iteration_bounds = array<i64: 2>, scalar_prefetch = 0 : i64, scratch_operands = 4 : i64, tpu.core_type = #tpu.core_type<tc>, window_params = [{transform_indices = @transform_0, window_bounds = array<i64: 128, 32>}, {pipeline_mode = #tpu.pipeline_mode<synchronous>, transform_indices = @transform_1, window_bounds = array<i64: 16, 32>}, {transform_indices = @transform_2, window_bounds = array<i64: 128, 32>}, {pipeline_mode = #tpu.pipeline_mode<synchronous>, transform_indices = @transform_3, window_bounds = array<i64: 16, 32>}, {transform_indices = @transform_4, window_bounds = array<i64: 1, 128>}, {pipeline_mode = #tpu.pipeline_mode<synchronous>, transform_indices = @transform_5, window_bounds = array<i64: 16, 1>}, {pipeline_mode = #tpu.pipeline_mode<synchronous>, transform_indices = @transform_6, window_bounds = array<i64: 1, 16>}, {pipeline_mode = #tpu.pipeline_mode<synchronous>, transform_indices = @transform_7, window_bounds = array<i64: 32, 128>}, {pipeline_mode = #tpu.pipeline_mode<synchronous>, transform_indices = @transform_8, window_bounds = array<i64: 32, 128>}, {pipeline_mode = #tpu.pipeline_mode<synchronous>, transform_indices = @transform_9, window_bounds = array<i64: 32, 64>}, {pipeline_mode = #tpu.pipeline_mode<synchronous>, transform_indices = @transform_10, window_bounds = array<i64: 64, 32>}, {pipeline_mode = #tpu.pipeline_mode<synchronous>, transform_indices = @transform_11, window_bounds = array<i64: 16, 64>}, {pipeline_mode = #tpu.pipeline_mode<synchronous>, transform_indices = @transform_12, window_bounds = array<i64: 16, 32>}]} {
    %c0 = arith.constant 0 : index
    %c0_0 = arith.constant 0 : index
    %0 = vector.load %arg12[%c0, %c0_0] : memref<16x64xf32, #tpu.memory_space<vmem>>, vector<16x64xf32>
    %c0_1 = arith.constant 0 : index
    %c0_2 = arith.constant 0 : index
    %1 = vector.load %arg6[%c0_1, %c0_2] : memref<16x1xi32, #tpu.memory_space<vmem>>, vector<16x1xi32>
    %c0_i32 = arith.constant 0 : i32
    %2 = arith.cmpi eq, %arg0, %c0_i32 : i32
    %3 = arith.extui %2 : i1 to i32
    %c0_i32_3 = arith.constant 0 : i32
    %4 = arith.cmpi ne, %3, %c0_i32_3 : i32
    scf.if %4 {
      %cst_34 = arith.constant -1.000000e+30 : f32
      %61 = vector.broadcast %cst_34 : f32 to vector<64x1xf32>
      %c0_35 = arith.constant 0 : index
      %c0_36 = arith.constant 0 : index
      %62 = vector.load %arg14[%c0_35, %c0_36] : memref<64x1xf32, #tpu.memory_space<vmem>>, vector<64x1xf32>
      tpu.vector_store %arg14[%c0_35, %c0_36], %61 {strides = array<i32>} : memref<64x1xf32, #tpu.memory_space<vmem>>, vector<64x1xf32>,
      %cst_37 = arith.constant 0.000000e+00 : f32
      %63 = vector.broadcast %cst_37 : f32 to vector<64x1xf32>
      %c0_38 = arith.constant 0 : index
      %c0_39 = arith.constant 0 : index
      %64 = vector.load %arg15[%c0_38, %c0_39] : memref<64x1xf32, #tpu.memory_space<vmem>>, vector<64x1xf32>
      tpu.vector_store %arg15[%c0_38, %c0_39], %63 {strides = array<i32>} : memref<64x1xf32, #tpu.memory_space<vmem>>, vector<64x1xf32>,
      %cst_40 = arith.constant 0.000000e+00 : f32
      %65 = vector.broadcast %cst_40 : f32 to vector<64x32xf32>
      %c0_41 = arith.constant 0 : index
      %c0_42 = arith.constant 0 : index
      %66 = vector.load %arg16[%c0_41, %c0_42] : memref<64x32xf32, #tpu.memory_space<vmem>>, vector<64x32xf32>
      tpu.vector_store %arg16[%c0_41, %c0_42], %65 {strides = array<i32>} : memref<64x32xf32, #tpu.memory_space<vmem>>, vector<64x32xf32>,
      %c0_43 = arith.constant 0 : index
      %c0_44 = arith.constant 0 : index
      %67 = vector.load %arg2[%c0_43, %c0_44] : memref<16x32xf32, #tpu.memory_space<vmem>>, vector<16x32xf32>
      %c0_45 = arith.constant 0 : index
      %c0_46 = arith.constant 0 : index
      %68 = vector.load %arg4[%c0_45, %c0_46] : memref<16x32xf32, #tpu.memory_space<vmem>>, vector<16x32xf32>
      %69 = arith.addf %67, %68 : vector<16x32xf32>
      %70 = arith.truncf %69 : vector<16x32xf32> to vector<16x32xbf16>
      %c0_47 = arith.constant 0 : index
      %c0_48 = arith.constant 0 : index
      %71 = vector.load %arg8[%c0_47, %c0_48] : memref<32x128xbf16, #tpu.memory_space<vmem>>, vector<32x128xbf16>
      %72 = vector.extract_strided_slice %71 {offsets = [0, 0], sizes = [32, 32], strides = [1, 1]} : vector<32x128xbf16> to vector<32x32xbf16>
      %cst_49 = arith.constant dense<0.000000e+00> : vector<16x32xf32>
      %73 = tpu.matmul %70, %72, %cst_49 {dimension_numbers = #tpu.dot_dimension_numbers<[1], [0], [0], [1], [0, 0, 1, 1], [], []>} : vector<16x32xbf16>, vector<32x32xbf16>, vector<16x32xf32> -> vector<16x32xf32>
      %74 = vector.extract_strided_slice %0 {offsets = [0, 0], sizes = [1, 32], strides = [1, 1]} : vector<16x64xf32> to vector<1x32xf32>
      %75 = vector.broadcast %74 : vector<1x32xf32> to vector<16x32xf32>
      %76 = arith.addf %73, %75 : vector<16x32xf32>
      %77 = vector.shape_cast %76 : vector<16x32xf32> to vector<1x16x32xf32>
      %78 = vector.shape_cast %77 : vector<1x16x32xf32> to vector<1x16x32xf32>
      %79 = vector.broadcast %78 : vector<1x16x32xf32> to vector<4x16x32xf32>
      %80 = vector.shape_cast %79 : vector<4x16x32xf32> to vector<64x32xf32>
      %81 = tpu.iota {dimensions = array<i32: 0>} : vector<4x16x32xi32>
      %82 = vector.shape_cast %81 : vector<4x16x32xi32> to vector<64x32xi32>
      %83 = tpu.iota {dimensions = array<i32: 1>} : vector<64x32xi32>
      %c8_i32 = arith.constant 8 : i32
      %84 = vector.broadcast %c8_i32 : i32 to vector<64x32xi32>
      %85 = arith.muli %82, %84 : vector<64x32xi32>
      %86 = arith.cmpi sge, %83, %85 : vector<64x32xi32>
      %c8_i32_50 = arith.constant 8 : i32
      %87 = vector.broadcast %c8_i32_50 : i32 to vector<64x32xi32>
      %88 = arith.addi %85, %87 : vector<64x32xi32>
      %89 = arith.cmpi slt, %83, %88 : vector<64x32xi32>
      %90 = arith.andi %86, %89 : vector<64x32xi1>
      %91 = arith.extui %90 : vector<64x32xi1> to vector<64x32xi32>
      %92 = arith.sitofp %91 : vector<64x32xi32> to vector<64x32xf32>
      %93 = arith.mulf %80, %92 : vector<64x32xf32>
      %94 = arith.truncf %93 : vector<64x32xf32> to vector<64x32xbf16>
      %c0_51 = arith.constant 0 : index
      %c0_52 = arith.constant 0 : index
      %95 = vector.load %arg17[%c0_51, %c0_52] : memref<64x32xbf16, #tpu.memory_space<vmem>>, vector<64x32xbf16>
      tpu.vector_store %arg17[%c0_51, %c0_52], %94 {strides = array<i32>} : memref<64x32xbf16, #tpu.memory_space<vmem>>, vector<64x32xbf16>,
    } else {
    }
    %c0_4 = arith.constant 0 : index
    %c0_5 = arith.constant 0 : index
    %5 = vector.load %arg1[%c0_4, %c0_5] : memref<128x32xbf16, #tpu.memory_space<vmem>>, vector<128x32xbf16>
    %c0_6 = arith.constant 0 : index
    %c0_7 = arith.constant 0 : index
    %6 = vector.load %arg8[%c0_6, %c0_7] : memref<32x128xbf16, #tpu.memory_space<vmem>>, vector<32x128xbf16>
    %c0_8 = arith.constant 0 : index
    %c0_9 = arith.constant 0 : index
    %7 = vector.load %arg3[%c0_8, %c0_9] : memref<128x32xbf16, #tpu.memory_space<vmem>>, vector<128x32xbf16>
    %8 = arith.addf %5, %7 : vector<128x32xbf16>
    %9 = vector.extract_strided_slice %6 {offsets = [0, 32], sizes = [32, 32], strides = [1, 1]} : vector<32x128xbf16> to vector<32x32xbf16>
    %cst = arith.constant dense<0.000000e+00> : vector<128x32xf32>
    %10 = tpu.matmul %8, %9, %cst {dimension_numbers = #tpu.dot_dimension_numbers<[1], [0], [0], [1], [0, 0, 1, 1], [], []>} : vector<128x32xbf16>, vector<32x32xbf16>, vector<128x32xf32> -> vector<128x32xf32>
    %11 = vector.extract_strided_slice %0 {offsets = [1, 0], sizes = [1, 32], strides = [1, 1]} : vector<16x64xf32> to vector<1x32xf32>
    %12 = vector.broadcast %11 : vector<1x32xf32> to vector<128x32xf32>
    %13 = arith.addf %10, %12 : vector<128x32xf32>
    %14 = vector.extract_strided_slice %6 {offsets = [0, 64], sizes = [32, 32], strides = [1, 1]} : vector<32x128xbf16> to vector<32x32xbf16>
    %cst_10 = arith.constant dense<0.000000e+00> : vector<128x32xf32>
    %15 = tpu.matmul %5, %14, %cst_10 {dimension_numbers = #tpu.dot_dimension_numbers<[1], [0], [0], [1], [0, 0, 1, 1], [], []>} : vector<128x32xbf16>, vector<32x32xbf16>, vector<128x32xf32> -> vector<128x32xf32>
    %16 = vector.extract_strided_slice %0 {offsets = [2, 0], sizes = [1, 32], strides = [1, 1]} : vector<16x64xf32> to vector<1x32xf32>
    %17 = vector.broadcast %16 : vector<1x32xf32> to vector<128x32xf32>
    %18 = arith.addf %15, %17 : vector<128x32xf32>
    %c0_11 = arith.constant 0 : index
    %c0_12 = arith.constant 0 : index
    %19 = vector.load %arg17[%c0_11, %c0_12] : memref<64x32xbf16, #tpu.memory_space<vmem>>, vector<64x32xbf16>
    %20 = arith.truncf %13 : vector<128x32xf32> to vector<128x32xbf16>
    %cst_13 = arith.constant dense<0.000000e+00> : vector<64x128xf32>
    %21 = tpu.matmul %19, %20, %cst_13 {dimension_numbers = #tpu.dot_dimension_numbers<[1], [1], [0], [0], [0, 0, 1, 0], [], []>} : vector<64x32xbf16>, vector<128x32xbf16>, vector<64x128xf32> -> vector<64x128xf32>
    %c0_14 = arith.constant 0 : index
    %c0_15 = arith.constant 0 : index
    %22 = vector.load %arg5[%c0_14, %c0_15] : memref<1x128xi32, #tpu.memory_space<vmem>>, vector<1x128xi32>
    %23 = vector.broadcast %1 : vector<16x1xi32> to vector<16x128xi32>
    %24 = vector.broadcast %22 : vector<1x128xi32> to vector<16x128xi32>
    %25 = arith.cmpi ne, %23, %24 : vector<16x128xi32>
    %cst_16 = arith.constant -1.000000e+09 : f32
    %cst_17 = arith.constant 0.000000e+00 : f32
    %26 = vector.broadcast %cst_16 : f32 to vector<16x128xf32>
    %27 = vector.broadcast %cst_17 : f32 to vector<16x128xf32>
    %28 = arith.select %25, %26, %27 : vector<16x128xi1>, vector<16x128xf32>
    %29 = vector.shape_cast %21 : vector<64x128xf32> to vector<4x16x128xf32>
    %30 = vector.shape_cast %28 : vector<16x128xf32> to vector<1x16x128xf32>
    %31 = vector.broadcast %30 : vector<1x16x128xf32> to vector<4x16x128xf32>
    %32 = arith.addf %29, %31 : vector<4x16x128xf32>
    %33 = vector.shape_cast %32 : vector<4x16x128xf32> to vector<64x128xf32>
    %c0_18 = arith.constant 0 : index
    %c0_19 = arith.constant 0 : index
    %34 = vector.load %arg14[%c0_18, %c0_19] : memref<64x1xf32, #tpu.memory_space<vmem>>, vector<64x1xf32>
    %cst_20 = arith.constant dense<0xFF800000> : vector<64xf32>
    %35 = vector.multi_reduction <maximumf>, %33, %cst_20 [1] : vector<64x128xf32> to vector<64xf32>
    %36 = vector.shape_cast %35 : vector<64xf32> to vector<64x1xf32>
    %37 = arith.maximumf %34, %36 : vector<64x1xf32>
    %38 = arith.subf %34, %37 : vector<64x1xf32>
    %39 = math.exp %38 : vector<64x1xf32>
    %40 = vector.broadcast %37 : vector<64x1xf32> to vector<64x128xf32>
    %41 = arith.subf %33, %40 : vector<64x128xf32>
    %42 = math.exp %41 : vector<64x128xf32>
    %c0_21 = arith.constant 0 : index
    %c0_22 = arith.constant 0 : index
    %43 = vector.load %arg15[%c0_21, %c0_22] : memref<64x1xf32, #tpu.memory_space<vmem>>, vector<64x1xf32>
    %44 = arith.mulf %39, %43 : vector<64x1xf32>
    %cst_23 = arith.constant dense<0.000000e+00> : vector<64xf32>
    %45 = vector.multi_reduction <add>, %42, %cst_23 [1] : vector<64x128xf32> to vector<64xf32>
    %46 = vector.shape_cast %45 : vector<64xf32> to vector<64x1xf32>
    %47 = arith.addf %44, %46 : vector<64x1xf32>
    %c0_24 = arith.constant 0 : index
    %c0_25 = arith.constant 0 : index
    %48 = vector.load %arg15[%c0_24, %c0_25] : memref<64x1xf32, #tpu.memory_space<vmem>>, vector<64x1xf32>
    tpu.vector_store %arg15[%c0_24, %c0_25], %47 {strides = array<i32>} : memref<64x1xf32, #tpu.memory_space<vmem>>, vector<64x1xf32>,
    %c0_26 = arith.constant 0 : index
    %c0_27 = arith.constant 0 : index
    %49 = vector.load %arg16[%c0_26, %c0_27] : memref<64x32xf32, #tpu.memory_space<vmem>>, vector<64x32xf32>
    %50 = vector.broadcast %39 : vector<64x1xf32> to vector<64x32xf32>
    %51 = arith.mulf %50, %49 : vector<64x32xf32>
    %52 = arith.truncf %42 : vector<64x128xf32> to vector<64x128xbf16>
    %53 = arith.truncf %18 : vector<128x32xf32> to vector<128x32xbf16>
    %cst_28 = arith.constant dense<0.000000e+00> : vector<64x32xf32>
    %54 = tpu.matmul %52, %53, %cst_28 {dimension_numbers = #tpu.dot_dimension_numbers<[1], [0], [0], [1], [0, 0, 1, 1], [], []>} : vector<64x128xbf16>, vector<128x32xbf16>, vector<64x32xf32> -> vector<64x32xf32>
    %55 = arith.addf %51, %54 : vector<64x32xf32>
    %c0_29 = arith.constant 0 : index
    %c0_30 = arith.constant 0 : index
    %56 = vector.load %arg16[%c0_29, %c0_30] : memref<64x32xf32, #tpu.memory_space<vmem>>, vector<64x32xf32>
    tpu.vector_store %arg16[%c0_29, %c0_30], %55 {strides = array<i32>} : memref<64x32xf32, #tpu.memory_space<vmem>>, vector<64x32xf32>,
    %c0_31 = arith.constant 0 : index
    %c0_32 = arith.constant 0 : index
    %57 = vector.load %arg14[%c0_31, %c0_32] : memref<64x1xf32, #tpu.memory_space<vmem>>, vector<64x1xf32>
    tpu.vector_store %arg14[%c0_31, %c0_32], %37 {strides = array<i32>} : memref<64x1xf32, #tpu.memory_space<vmem>>, vector<64x1xf32>,
    %c1_i32 = arith.constant 1 : i32
    %58 = arith.cmpi eq, %arg0, %c1_i32 : i32
    %59 = arith.extui %58 : i1 to i32
    %c0_i32_33 = arith.constant 0 : i32
    %60 = arith.cmpi ne, %59, %c0_i32_33 : i32
    scf.if %60 {
      %61 = tpu.iota {dimensions = array<i32: 0>} : vector<4x16x32xi32>
      %62 = vector.shape_cast %61 : vector<4x16x32xi32> to vector<64x32xi32>
      %63 = tpu.iota {dimensions = array<i32: 1>} : vector<64x32xi32>
      %c8_i32 = arith.constant 8 : i32
      %64 = vector.broadcast %c8_i32 : i32 to vector<64x32xi32>
      %65 = arith.muli %62, %64 : vector<64x32xi32>
      %66 = arith.cmpi sge, %63, %65 : vector<64x32xi32>
      %c8_i32_34 = arith.constant 8 : i32
      %67 = vector.broadcast %c8_i32_34 : i32 to vector<64x32xi32>
      %68 = arith.addi %65, %67 : vector<64x32xi32>
      %69 = arith.cmpi slt, %63, %68 : vector<64x32xi32>
      %70 = arith.andi %66, %69 : vector<64x32xi1>
      %71 = arith.extui %70 : vector<64x32xi1> to vector<64x32xi32>
      %72 = arith.sitofp %71 : vector<64x32xi32> to vector<64x32xf32>
      %c0_35 = arith.constant 0 : index
      %c0_36 = arith.constant 0 : index
      %73 = vector.load %arg2[%c0_35, %c0_36] : memref<16x32xf32, #tpu.memory_space<vmem>>, vector<16x32xf32>
      %c0_37 = arith.constant 0 : index
      %c0_38 = arith.constant 0 : index
      %74 = vector.load %arg4[%c0_37, %c0_38] : memref<16x32xf32, #tpu.memory_space<vmem>>, vector<16x32xf32>
      %c0_39 = arith.constant 0 : index
      %c0_40 = arith.constant 0 : index
      %75 = vector.load %arg16[%c0_39, %c0_40] : memref<64x32xf32, #tpu.memory_space<vmem>>, vector<64x32xf32>
      %76 = arith.mulf %75, %72 : vector<64x32xf32>
      %c0_41 = arith.constant 0 : index
      %c0_42 = arith.constant 0 : index
      %77 = vector.load %arg15[%c0_41, %c0_42] : memref<64x1xf32, #tpu.memory_space<vmem>>, vector<64x1xf32>
      %78 = tpu.reciprocal %77 {approx = true} : vector<64x1xf32> -> vector<64x1xf32>
      %79 = vector.broadcast %78 : vector<64x1xf32> to vector<64x32xf32>
      %80 = arith.mulf %76, %79 : vector<64x32xf32>
      %81 = vector.shape_cast %80 : vector<64x32xf32> to vector<4x16x32xf32>
      %82 = vector.extract_strided_slice %81 {offsets = [0, 0, 0], sizes = [1, 16, 32], strides = [1, 1, 1]} : vector<4x16x32xf32> to vector<1x16x32xf32>
      %83 = vector.shape_cast %82 : vector<1x16x32xf32> to vector<16x32xf32>
      %84 = vector.extract_strided_slice %81 {offsets = [1, 0, 0], sizes = [1, 16, 32], strides = [1, 1, 1]} : vector<4x16x32xf32> to vector<1x16x32xf32>
      %85 = vector.shape_cast %84 : vector<1x16x32xf32> to vector<16x32xf32>
      %86 = arith.addf %83, %85 : vector<16x32xf32>
      %87 = vector.extract_strided_slice %81 {offsets = [2, 0, 0], sizes = [1, 16, 32], strides = [1, 1, 1]} : vector<4x16x32xf32> to vector<1x16x32xf32>
      %88 = vector.shape_cast %87 : vector<1x16x32xf32> to vector<16x32xf32>
      %89 = arith.addf %86, %88 : vector<16x32xf32>
      %90 = vector.extract_strided_slice %81 {offsets = [3, 0, 0], sizes = [1, 16, 32], strides = [1, 1, 1]} : vector<4x16x32xf32> to vector<1x16x32xf32>
      %91 = vector.shape_cast %90 : vector<1x16x32xf32> to vector<16x32xf32>
      %92 = arith.addf %89, %91 : vector<16x32xf32>
      %93 = arith.truncf %92 : vector<16x32xf32> to vector<16x32xbf16>
      %94 = vector.extract_strided_slice %6 {offsets = [0, 96], sizes = [32, 32], strides = [1, 1]} : vector<32x128xbf16> to vector<32x32xbf16>
      %cst_43 = arith.constant dense<0.000000e+00> : vector<16x32xf32>
      %95 = tpu.matmul %93, %94, %cst_43 {dimension_numbers = #tpu.dot_dimension_numbers<[1], [0], [0], [1], [0, 0, 1, 1], [], []>} : vector<16x32xbf16>, vector<32x32xbf16>, vector<16x32xf32> -> vector<16x32xf32>
      %96 = vector.extract_strided_slice %0 {offsets = [3, 0], sizes = [1, 32], strides = [1, 1]} : vector<16x64xf32> to vector<1x32xf32>
      %97 = vector.broadcast %96 : vector<1x32xf32> to vector<16x32xf32>
      %98 = arith.addf %95, %97 : vector<16x32xf32>
      %99 = arith.addf %73, %98 : vector<16x32xf32>
      %100 = vector.extract_strided_slice %0 {offsets = [4, 0], sizes = [1, 32], strides = [1, 1]} : vector<16x64xf32> to vector<1x32xf32>
      %101 = vector.extract_strided_slice %0 {offsets = [5, 0], sizes = [1, 32], strides = [1, 1]} : vector<16x64xf32> to vector<1x32xf32>
      %cst_44 = arith.constant dense<0.000000e+00> : vector<16xf32>
      %102 = vector.multi_reduction <add>, %99, %cst_44 [1] : vector<16x32xf32> to vector<16xf32>
      %103 = vector.shape_cast %102 : vector<16xf32> to vector<16x1xf32>
      %cst_45 = arith.constant 3.200000e+01 : f32
      %104 = vector.broadcast %cst_45 : f32 to vector<16x1xf32>
      %105 = arith.divf %103, %104 : vector<16x1xf32>
      %106 = vector.broadcast %105 : vector<16x1xf32> to vector<16x32xf32>
      %107 = arith.subf %99, %106 : vector<16x32xf32>
      %108 = arith.mulf %107, %107 : vector<16x32xf32>
      %cst_46 = arith.constant dense<0.000000e+00> : vector<16xf32>
      %109 = vector.multi_reduction <add>, %108, %cst_46 [1] : vector<16x32xf32> to vector<16xf32>
      %110 = vector.shape_cast %109 : vector<16xf32> to vector<16x1xf32>
      %cst_47 = arith.constant 3.200000e+01 : f32
      %111 = vector.broadcast %cst_47 : f32 to vector<16x1xf32>
      %112 = arith.divf %110, %111 : vector<16x1xf32>
      %cst_48 = arith.constant 9.99999974E-6 : f32
      %113 = vector.broadcast %cst_48 : f32 to vector<16x1xf32>
      %114 = arith.addf %112, %113 : vector<16x1xf32>
      %115 = math.rsqrt %114 : vector<16x1xf32>
      %116 = vector.broadcast %115 : vector<16x1xf32> to vector<16x32xf32>
      %117 = arith.mulf %107, %116 : vector<16x32xf32>
      %118 = vector.broadcast %100 : vector<1x32xf32> to vector<16x32xf32>
      %119 = arith.mulf %117, %118 : vector<16x32xf32>
      %120 = vector.broadcast %101 : vector<1x32xf32> to vector<16x32xf32>
      %121 = arith.addf %119, %120 : vector<16x32xf32>
      %c0_49 = arith.constant 0 : index
      %c0_50 = arith.constant 0 : index
      %122 = vector.load %arg7[%c0_49, %c0_50] : memref<1x16xi32, #tpu.memory_space<vmem>>, vector<1x16xi32>
      %123 = vector.broadcast %1 : vector<16x1xi32> to vector<16x16xi32>
      %124 = vector.broadcast %122 : vector<1x16xi32> to vector<16x16xi32>
      %125 = arith.cmpi ne, %123, %124 : vector<16x16xi32>
      %cst_51 = arith.constant -1.000000e+09 : f32
      %cst_52 = arith.constant 0.000000e+00 : f32
      %126 = vector.broadcast %cst_51 : f32 to vector<16x16xf32>
      %127 = vector.broadcast %cst_52 : f32 to vector<16x16xf32>
      %128 = arith.select %125, %126, %127 : vector<16x16xi1>, vector<16x16xf32>
      %c0_53 = arith.constant 0 : index
      %c0_54 = arith.constant 0 : index
      %129 = vector.load %arg9[%c0_53, %c0_54] : memref<32x128xbf16, #tpu.memory_space<vmem>>, vector<32x128xbf16>
      %130 = arith.addf %121, %74 : vector<16x32xf32>
      %131 = arith.truncf %130 : vector<16x32xf32> to vector<16x32xbf16>
      %132 = vector.extract_strided_slice %129 {offsets = [0, 0], sizes = [32, 64], strides = [1, 1]} : vector<32x128xbf16> to vector<32x64xbf16>
      %cst_55 = arith.constant dense<0.000000e+00> : vector<16x64xf32>
      %133 = tpu.matmul %131, %132, %cst_55 {dimension_numbers = #tpu.dot_dimension_numbers<[1], [0], [0], [1], [0, 0, 1, 1], [], []>} : vector<16x32xbf16>, vector<32x64xbf16>, vector<16x64xf32> -> vector<16x64xf32>
      %134 = vector.extract_strided_slice %133 {offsets = [0, 0], sizes = [16, 32], strides = [1, 1]} : vector<16x64xf32> to vector<16x32xf32>
      %135 = vector.extract_strided_slice %0 {offsets = [6, 0], sizes = [1, 32], strides = [1, 1]} : vector<16x64xf32> to vector<1x32xf32>
      %136 = vector.broadcast %135 : vector<1x32xf32> to vector<16x32xf32>
      %137 = arith.addf %134, %136 : vector<16x32xf32>
      %138 = vector.extract_strided_slice %133 {offsets = [0, 32], sizes = [16, 32], strides = [1, 1]} : vector<16x64xf32> to vector<16x32xf32>
      %139 = vector.extract_strided_slice %0 {offsets = [7, 0], sizes = [1, 32], strides = [1, 1]} : vector<16x64xf32> to vector<1x32xf32>
      %140 = vector.broadcast %139 : vector<1x32xf32> to vector<16x32xf32>
      %141 = arith.addf %138, %140 : vector<16x32xf32>
      %142 = arith.truncf %121 : vector<16x32xf32> to vector<16x32xbf16>
      %143 = vector.extract_strided_slice %129 {offsets = [0, 64], sizes = [32, 32], strides = [1, 1]} : vector<32x128xbf16> to vector<32x32xbf16>
      %cst_56 = arith.constant dense<0.000000e+00> : vector<16x32xf32>
      %144 = tpu.matmul %142, %143, %cst_56 {dimension_numbers = #tpu.dot_dimension_numbers<[1], [0], [0], [1], [0, 0, 1, 1], [], []>} : vector<16x32xbf16>, vector<32x32xbf16>, vector<16x32xf32> -> vector<16x32xf32>
      %145 = vector.extract_strided_slice %0 {offsets = [8, 0], sizes = [1, 32], strides = [1, 1]} : vector<16x64xf32> to vector<1x32xf32>
      %146 = vector.broadcast %145 : vector<1x32xf32> to vector<16x32xf32>
      %147 = arith.addf %144, %146 : vector<16x32xf32>
      %148 = vector.shape_cast %137 : vector<16x32xf32> to vector<1x16x32xf32>
      %149 = vector.shape_cast %148 : vector<1x16x32xf32> to vector<1x16x32xf32>
      %150 = vector.broadcast %149 : vector<1x16x32xf32> to vector<4x16x32xf32>
      %151 = vector.shape_cast %150 : vector<4x16x32xf32> to vector<64x32xf32>
      %152 = arith.mulf %151, %72 : vector<64x32xf32>
      %153 = arith.truncf %152 : vector<64x32xf32> to vector<64x32xbf16>
      %154 = arith.truncf %141 : vector<16x32xf32> to vector<16x32xbf16>
      %cst_57 = arith.constant dense<0.000000e+00> : vector<64x16xf32>
      %155 = tpu.matmul %153, %154, %cst_57 {dimension_numbers = #tpu.dot_dimension_numbers<[1], [1], [0], [0], [0, 0, 1, 0], [], []>} : vector<64x32xbf16>, vector<16x32xbf16>, vector<64x16xf32> -> vector<64x16xf32>
      %156 = vector.shape_cast %155 : vector<64x16xf32> to vector<4x16x16xf32>
      %157 = vector.shape_cast %128 : vector<16x16xf32> to vector<1x16x16xf32>
      %158 = vector.broadcast %157 : vector<1x16x16xf32> to vector<4x16x16xf32>
      %159 = arith.addf %156, %158 : vector<4x16x16xf32>
      %160 = vector.shape_cast %159 : vector<4x16x16xf32> to vector<64x16xf32>
      %cst_58 = arith.constant dense<0xFF800000> : vector<64xf32>
      %161 = vector.multi_reduction <maximumf>, %160, %cst_58 [1] : vector<64x16xf32> to vector<64xf32>
      %162 = vector.shape_cast %161 : vector<64xf32> to vector<64x1xf32>
      %163 = vector.broadcast %162 : vector<64x1xf32> to vector<64x16xf32>
      %164 = arith.subf %160, %163 : vector<64x16xf32>
      %165 = math.exp %164 : vector<64x16xf32>
      %cst_59 = arith.constant dense<0.000000e+00> : vector<64xf32>
      %166 = vector.multi_reduction <add>, %165, %cst_59 [1] : vector<64x16xf32> to vector<64xf32>
      %167 = vector.shape_cast %166 : vector<64xf32> to vector<64x1xf32>
      %168 = tpu.reciprocal %167 {approx = true} : vector<64x1xf32> -> vector<64x1xf32>
      %169 = vector.broadcast %168 : vector<64x1xf32> to vector<64x16xf32>
      %170 = arith.mulf %165, %169 : vector<64x16xf32>
      %171 = arith.truncf %170 : vector<64x16xf32> to vector<64x16xbf16>
      %172 = arith.truncf %147 : vector<16x32xf32> to vector<16x32xbf16>
      %cst_60 = arith.constant dense<0.000000e+00> : vector<64x32xf32>
      %173 = tpu.matmul %171, %172, %cst_60 {dimension_numbers = #tpu.dot_dimension_numbers<[1], [0], [0], [1], [0, 0, 1, 1], [], []>} : vector<64x16xbf16>, vector<16x32xbf16>, vector<64x32xf32> -> vector<64x32xf32>
      %174 = arith.mulf %173, %72 : vector<64x32xf32>
      %175 = vector.shape_cast %174 : vector<64x32xf32> to vector<4x16x32xf32>
      %176 = vector.extract_strided_slice %175 {offsets = [0, 0, 0], sizes = [1, 16, 32], strides = [1, 1, 1]} : vector<4x16x32xf32> to vector<1x16x32xf32>
      %177 = vector.shape_cast %176 : vector<1x16x32xf32> to vector<16x32xf32>
      %178 = vector.extract_strided_slice %175 {offsets = [1, 0, 0], sizes = [1, 16, 32], strides = [1, 1, 1]} : vector<4x16x32xf32> to vector<1x16x32xf32>
      %179 = vector.shape_cast %178 : vector<1x16x32xf32> to vector<16x32xf32>
      %180 = arith.addf %177, %179 : vector<16x32xf32>
      %181 = vector.extract_strided_slice %175 {offsets = [2, 0, 0], sizes = [1, 16, 32], strides = [1, 1, 1]} : vector<4x16x32xf32> to vector<1x16x32xf32>
      %182 = vector.shape_cast %181 : vector<1x16x32xf32> to vector<16x32xf32>
      %183 = arith.addf %180, %182 : vector<16x32xf32>
      %184 = vector.extract_strided_slice %175 {offsets = [3, 0, 0], sizes = [1, 16, 32], strides = [1, 1, 1]} : vector<4x16x32xf32> to vector<1x16x32xf32>
      %185 = vector.shape_cast %184 : vector<1x16x32xf32> to vector<16x32xf32>
      %186 = arith.addf %183, %185 : vector<16x32xf32>
      %187 = arith.truncf %186 : vector<16x32xf32> to vector<16x32xbf16>
      %188 = vector.extract_strided_slice %129 {offsets = [0, 96], sizes = [32, 32], strides = [1, 1]} : vector<32x128xbf16> to vector<32x32xbf16>
      %cst_61 = arith.constant dense<0.000000e+00> : vector<16x32xf32>
      %189 = tpu.matmul %187, %188, %cst_61 {dimension_numbers = #tpu.dot_dimension_numbers<[1], [0], [0], [1], [0, 0, 1, 1], [], []>} : vector<16x32xbf16>, vector<32x32xbf16>, vector<16x32xf32> -> vector<16x32xf32>
      %190 = vector.extract_strided_slice %0 {offsets = [9, 0], sizes = [1, 32], strides = [1, 1]} : vector<16x64xf32> to vector<1x32xf32>
      %191 = vector.broadcast %190 : vector<1x32xf32> to vector<16x32xf32>
      %192 = arith.addf %189, %191 : vector<16x32xf32>
      %193 = arith.addf %121, %192 : vector<16x32xf32>
      %194 = vector.extract_strided_slice %0 {offsets = [10, 0], sizes = [1, 32], strides = [1, 1]} : vector<16x64xf32> to vector<1x32xf32>
      %195 = vector.extract_strided_slice %0 {offsets = [11, 0], sizes = [1, 32], strides = [1, 1]} : vector<16x64xf32> to vector<1x32xf32>
      %cst_62 = arith.constant dense<0.000000e+00> : vector<16xf32>
      %196 = vector.multi_reduction <add>, %193, %cst_62 [1] : vector<16x32xf32> to vector<16xf32>
      %197 = vector.shape_cast %196 : vector<16xf32> to vector<16x1xf32>
      %cst_63 = arith.constant 3.200000e+01 : f32
      %198 = vector.broadcast %cst_63 : f32 to vector<16x1xf32>
      %199 = arith.divf %197, %198 : vector<16x1xf32>
      %200 = vector.broadcast %199 : vector<16x1xf32> to vector<16x32xf32>
      %201 = arith.subf %193, %200 : vector<16x32xf32>
      %202 = arith.mulf %201, %201 : vector<16x32xf32>
      %cst_64 = arith.constant dense<0.000000e+00> : vector<16xf32>
      %203 = vector.multi_reduction <add>, %202, %cst_64 [1] : vector<16x32xf32> to vector<16xf32>
      %204 = vector.shape_cast %203 : vector<16xf32> to vector<16x1xf32>
      %cst_65 = arith.constant 3.200000e+01 : f32
      %205 = vector.broadcast %cst_65 : f32 to vector<16x1xf32>
      %206 = arith.divf %204, %205 : vector<16x1xf32>
      %cst_66 = arith.constant 9.99999974E-6 : f32
      %207 = vector.broadcast %cst_66 : f32 to vector<16x1xf32>
      %208 = arith.addf %206, %207 : vector<16x1xf32>
      %209 = math.rsqrt %208 : vector<16x1xf32>
      %210 = vector.broadcast %209 : vector<16x1xf32> to vector<16x32xf32>
      %211 = arith.mulf %201, %210 : vector<16x32xf32>
      %212 = vector.broadcast %194 : vector<1x32xf32> to vector<16x32xf32>
      %213 = arith.mulf %211, %212 : vector<16x32xf32>
      %214 = vector.broadcast %195 : vector<1x32xf32> to vector<16x32xf32>
      %215 = arith.addf %213, %214 : vector<16x32xf32>
      %216 = arith.truncf %215 : vector<16x32xf32> to vector<16x32xbf16>
      %c0_67 = arith.constant 0 : index
      %c0_68 = arith.constant 0 : index
      %217 = vector.load %arg10[%c0_67, %c0_68] : memref<32x64xbf16, #tpu.memory_space<vmem>>, vector<32x64xbf16>
      %cst_69 = arith.constant dense<0.000000e+00> : vector<16x64xf32>
      %218 = tpu.matmul %216, %217, %cst_69 {dimension_numbers = #tpu.dot_dimension_numbers<[1], [0], [0], [1], [0, 0, 1, 1], [], []>} : vector<16x32xbf16>, vector<32x64xbf16>, vector<16x64xf32> -> vector<16x64xf32>
      %219 = vector.extract_strided_slice %0 {offsets = [15, 0], sizes = [1, 64], strides = [1, 1]} : vector<16x64xf32> to vector<1x64xf32>
      %220 = vector.broadcast %219 : vector<1x64xf32> to vector<16x64xf32>
      %221 = arith.addf %218, %220 : vector<16x64xf32>
      %cst_70 = arith.constant 0.000000e+00 : f32
      %222 = vector.broadcast %cst_70 : f32 to vector<16x64xf32>
      %223 = arith.maximumf %221, %222 : vector<16x64xf32>
      %224 = arith.truncf %223 : vector<16x64xf32> to vector<16x64xbf16>
      %c0_71 = arith.constant 0 : index
      %c0_72 = arith.constant 0 : index
      %225 = vector.load %arg11[%c0_71, %c0_72] : memref<64x32xbf16, #tpu.memory_space<vmem>>, vector<64x32xbf16>
      %cst_73 = arith.constant dense<0.000000e+00> : vector<16x32xf32>
      %226 = tpu.matmul %224, %225, %cst_73 {dimension_numbers = #tpu.dot_dimension_numbers<[1], [0], [0], [1], [0, 0, 1, 1], [], []>} : vector<16x64xbf16>, vector<64x32xbf16>, vector<16x32xf32> -> vector<16x32xf32>
      %227 = vector.extract_strided_slice %0 {offsets = [12, 0], sizes = [1, 32], strides = [1, 1]} : vector<16x64xf32> to vector<1x32xf32>
      %228 = vector.broadcast %227 : vector<1x32xf32> to vector<16x32xf32>
      %229 = arith.addf %226, %228 : vector<16x32xf32>
      %230 = arith.addf %215, %229 : vector<16x32xf32>
      %231 = vector.extract_strided_slice %0 {offsets = [13, 0], sizes = [1, 32], strides = [1, 1]} : vector<16x64xf32> to vector<1x32xf32>
      %232 = vector.extract_strided_slice %0 {offsets = [14, 0], sizes = [1, 32], strides = [1, 1]} : vector<16x64xf32> to vector<1x32xf32>
      %cst_74 = arith.constant dense<0.000000e+00> : vector<16xf32>
      %233 = vector.multi_reduction <add>, %230, %cst_74 [1] : vector<16x32xf32> to vector<16xf32>
      %234 = vector.shape_cast %233 : vector<16xf32> to vector<16x1xf32>
      %cst_75 = arith.constant 3.200000e+01 : f32
      %235 = vector.broadcast %cst_75 : f32 to vector<16x1xf32>
      %236 = arith.divf %234, %235 : vector<16x1xf32>
      %237 = vector.broadcast %236 : vector<16x1xf32> to vector<16x32xf32>
      %238 = arith.subf %230, %237 : vector<16x32xf32>
      %239 = arith.mulf %238, %238 : vector<16x32xf32>
      %cst_76 = arith.constant dense<0.000000e+00> : vector<16xf32>
      %240 = vector.multi_reduction <add>, %239, %cst_76 [1] : vector<16x32xf32> to vector<16xf32>
      %241 = vector.shape_cast %240 : vector<16xf32> to vector<16x1xf32>
      %cst_77 = arith.constant 3.200000e+01 : f32
      %242 = vector.broadcast %cst_77 : f32 to vector<16x1xf32>
      %243 = arith.divf %241, %242 : vector<16x1xf32>
      %cst_78 = arith.constant 9.99999974E-6 : f32
      %244 = vector.broadcast %cst_78 : f32 to vector<16x1xf32>
      %245 = arith.addf %243, %244 : vector<16x1xf32>
      %246 = math.rsqrt %245 : vector<16x1xf32>
      %247 = vector.broadcast %246 : vector<16x1xf32> to vector<16x32xf32>
      %248 = arith.mulf %238, %247 : vector<16x32xf32>
      %249 = vector.broadcast %231 : vector<1x32xf32> to vector<16x32xf32>
      %250 = arith.mulf %248, %249 : vector<16x32xf32>
      %251 = vector.broadcast %232 : vector<1x32xf32> to vector<16x32xf32>
      %252 = arith.addf %250, %251 : vector<16x32xf32>
      %c0_79 = arith.constant 0 : index
      %c0_80 = arith.constant 0 : index
      %253 = vector.load %arg13[%c0_79, %c0_80] : memref<16x32xf32, #tpu.memory_space<vmem>>, vector<16x32xf32>
      tpu.vector_store %arg13[%c0_79, %c0_80], %252 {strides = array<i32>} : memref<16x32xf32, #tpu.memory_space<vmem>>, vector<16x32xf32>,
    } else {
    }
    return
  }
  func.func @transform_0(%arg0: i32) -> (i32, i32) {
    %c0_i32 = arith.constant 0 : i32
    %c0_i32_0 = arith.constant 0 : i32
    return %arg0, %c0_i32 : i32, i32
  }
  func.func @transform_1(%arg0: i32) -> (i32, i32) {
    %c0_i32 = arith.constant 0 : i32
    %c0_i32_0 = arith.constant 0 : i32
    %c0_i32_1 = arith.constant 0 : i32
    return %c0_i32, %c0_i32_0 : i32, i32
  }
  func.func @transform_2(%arg0: i32) -> (i32, i32) {
    %c0_i32 = arith.constant 0 : i32
    %c0_i32_0 = arith.constant 0 : i32
    return %arg0, %c0_i32 : i32, i32
  }
  func.func @transform_3(%arg0: i32) -> (i32, i32) {
    %c0_i32 = arith.constant 0 : i32
    %c0_i32_0 = arith.constant 0 : i32
    %c0_i32_1 = arith.constant 0 : i32
    return %c0_i32, %c0_i32_0 : i32, i32
  }
  func.func @transform_4(%arg0: i32) -> (i32, i32) {
    %c0_i32 = arith.constant 0 : i32
    %c0_i32_0 = arith.constant 0 : i32
    return %c0_i32, %arg0 : i32, i32
  }
  func.func @transform_5(%arg0: i32) -> (i32, i32) {
    %c0_i32 = arith.constant 0 : i32
    %c0_i32_0 = arith.constant 0 : i32
    %c0_i32_1 = arith.constant 0 : i32
    return %c0_i32, %c0_i32_0 : i32, i32
  }
  func.func @transform_6(%arg0: i32) -> (i32, i32) {
    %c0_i32 = arith.constant 0 : i32
    %c0_i32_0 = arith.constant 0 : i32
    %c0_i32_1 = arith.constant 0 : i32
    return %c0_i32, %c0_i32_0 : i32, i32
  }
  func.func @transform_7(%arg0: i32) -> (i32, i32) {
    %c0_i32 = arith.constant 0 : i32
    %c0_i32_0 = arith.constant 0 : i32
    %c0_i32_1 = arith.constant 0 : i32
    return %c0_i32, %c0_i32_0 : i32, i32
  }
  func.func @transform_8(%arg0: i32) -> (i32, i32) {
    %c0_i32 = arith.constant 0 : i32
    %c0_i32_0 = arith.constant 0 : i32
    %c0_i32_1 = arith.constant 0 : i32
    return %c0_i32, %c0_i32_0 : i32, i32
  }
  func.func @transform_9(%arg0: i32) -> (i32, i32) {
    %c0_i32 = arith.constant 0 : i32
    %c0_i32_0 = arith.constant 0 : i32
    %c0_i32_1 = arith.constant 0 : i32
    return %c0_i32, %c0_i32_0 : i32, i32
  }
  func.func @transform_10(%arg0: i32) -> (i32, i32) {
    %c0_i32 = arith.constant 0 : i32
    %c0_i32_0 = arith.constant 0 : i32
    %c0_i32_1 = arith.constant 0 : i32
    return %c0_i32, %c0_i32_0 : i32, i32
  }
  func.func @transform_11(%arg0: i32) -> (i32, i32) {
    %c0_i32 = arith.constant 0 : i32
    %c0_i32_0 = arith.constant 0 : i32
    %c0_i32_1 = arith.constant 0 : i32
    return %c0_i32, %c0_i32_0 : i32, i32
  }
  func.func @transform_12(%arg0: i32) -> (i32, i32) {
    %c0_i32 = arith.constant 0 : i32
    %c0_i32_0 = arith.constant 0 : i32
    %c0_i32_1 = arith.constant 0 : i32
    return %c0_i32, %c0_i32_0 : i32, i32
  }
}

</mosaic_0001>

<bundles_post_ra>
// kernel: tpu_custom_call.1
= control target key start
LH: loop header
LB: loop body
LE: loop exit
PB: predicated region body
PF: predicated region fallthrough
CT: control target
= control target key end

     0   :  { %17 = vsyncpa [#allocation7], 0  ;;  %s3133_s21 = smov 0   ;;  %s3752_s0 = inlined_call_operand.vmem [shape: bf16[256,32], index: 0, kind: input, shape index: {}]   ;;  %s3753_s1 = inlined_call_operand.vmem [shape: f32[16,32], index: 1, kind: input, shape index: {}]   ;;  %s3754_s2 = inlined_call_operand.vmem [shape: bf16[256,32], index: 2, kind: input, shape index: {}]   ;;  %s3755_s3 = inlined_call_operand.vmem [shape: f32[16,32], index: 3, kind: input, shape index: {}]   ;;  %s3756_s4 = inlined_call_operand.vmem [shape: s32[1,256], index: 4, kind: input, shape index: {}]   ;;  %s3757_s5 = inlined_call_operand.vmem [shape: s32[16,1], index: 5, kind: input, shape index: {}]   ;;  %s3758_s6 = inlined_call_operand.vmem [shape: s32[1,16], index: 6, kind: input, shape index: {}]   ;;  %s3759_s7 = inlined_call_operand.vmem [shape: bf16[32,128], index: 7, kind: input, shape index: {}]   ;;  %s3760_s8 = inlined_call_operand.vmem [shape: bf16[32,128], index: 8, kind: input, shape index: {}]   ;;  %s3761_s9 = inlined_call_operand.vmem [shape: bf16[32,64], index: 9, kind: input, shape index: {}]   ;;  %s3762_s10 = inlined_call_operand.vmem [shape: bf16[64,32], index: 10, kind: input, shape index: {}]   ;;  %s3763_s11 = inlined_call_operand.vmem [shape: f32[16,64], index: 11, kind: input, shape index: {}]   ;;  %s3764_s12 = inlined_call_operand.hbm [shape: f32[16,32], index: 12, kind: output, shape index: {}]  }
   0x1 LB: > { %s3139_s22 = sadd.s32 4294967295, %s3050_s21   ;;  %p2508_p0 = scmp.ge.s32.totalorder %s3050_s21, 1  ;;  %s3050_s21 = sphi %s3133_s21, %s23_s21  }
   0x2   : > { %p378_p1 = scmp.lt.s32.totalorder %s3050_s21, 3 }
   0x4   : > { %p379_p2 = pnand %p2508_p0, %p378_p1 }
   0x5   : > { %s2509_s23 = sshll.u32 (!%p379_p2), %s3139_s22, 4  ;;  %p435_p3 = scmp.lt.s32.totalorder (!%p379_p2), %s3139_s22, 1 }
   0x6   : > { %382 = sbr.rel (%p379_p2) target bundleno = 4320 (0x10e0), region = 68  ;;  %p424_p4 = scmp.lt.s32.totalorder (!%p379_p2), %s2509_s23, 31 }
   0x7   : > { %p2513_p5 = scmp.ne.s32.totalorder (!%p379_p2), %s3139_s22, 0 }
   0xb   : > { %v3148_v0 = vld [vmem:[%s3763_s11] sm:$0xff]  ;;  %v3153_v1 = vld [vmem:[%s3763_s11 + $0x8] sm:$0xff]  ;;  %s3166_s14 = scalar_select %p435_p3, %s3139_s22, 1 }
   0xc   : > { %v3158_v2 = vld [vmem:[%s3757_s5] sm:$0xff]  ;;  %v3163_v3 = vld [vmem:[%s3757_s5 + $0x8] sm:$0xff]  ;;  %s3766_s23 = smov (!%p424_p4, %s2509_s23), 31  ;;  %446 = sbr.rel (%p2513_p5) target bundleno = 232 (0xe8), region = 72 }
   0xd   : > { %s437_s17 = scalar_lea.vmem %s3756_s4, %s3166_s14  ;;  %s2510_s18 = sshll.u32 %s3766_s23, 2 }
   0xe   : > { %s3175_s24 = scalar_lea.vmem %s3752_s0, %s2510_s18  ;;  %s3180_s27 = scalar_lea.vmem %s3754_s2, %s2510_s18 }
  0x11   : > { %vm447_vm0 = vcmask 7168   ;;  %v3052_v4 = vmov -1e+30   ;;  %v3053_v5 = vmov 0.0   ;;  %v2896_v6 = vld [vmem:[%s3759_s7 + $0x8] sm:$0xff]   ;;  %v2897_v7 = vld [vmem:[%s3759_s7] sm:$0xff]   ;;  %v484_v15 = vlaneseq }
  0x12   : > { %448 = vst.msk [vmem:[#allocation2] sm:$0xff] %vm447_vm0, %v3052_v4  ;;  %449 = vst.msk [vmem:[#allocation2 + $0x8] sm:$0xff] %vm447_vm0, %v3052_v4  ;;  %2689 = vmatprep.subr.bf16.mxu0 %v3053_v5  ;;  %vm3054_vm1 = vmmov 0   ;;  %vm464_vm2 = vcmask 261120   ;;  %v473_v8 = vld [vmem:[%s3753_s1] sm:$0xff]  ;;  %v474_v9 = vld [vmem:[%s3753_s1 + $0x8] sm:$0xff] }
  0x13   : > { %450 = vst.msk [vmem:[#allocation2 + $0x10] sm:$0xff] %vm447_vm0, %v3052_v4  ;;  %451 = vst.msk [vmem:[#allocation2 + $0x18] sm:$0xff] %vm447_vm0, %v3052_v4  ;;  %2693 = vmatprep.mubr.msk.bf16.mxu0 %vm3054_vm1, %v3053_v5  ;;  %2690 = vmatpush3.bf16.msra.mxu0 %v2896_v6  ;;  %v475_v10 = vld [vmem:[%s3755_s3] sm:$0xff]  ;;  %v476_v11 = vld [vmem:[%s3755_s3 + $0x8] sm:$0xff]  ;;  %v545_v16 = vand.u32 127, %v484_v15  ;;  %v485_v17 = vshrl.u32 %v484_v15, 7 }
  0x14   : > { %452 = vst.msk [vmem:[#allocation2 + $0x20] sm:$0xff] %vm447_vm0, %v3052_v4  ;;  %453 = vst.msk [vmem:[#allocation2 + $0x28] sm:$0xff] %vm447_vm0, %v3052_v4  ;;  %2691 = vmatprep.subr.bf16.mxu0 %v3053_v5  ;;  %v477_v12 = vadd.f32 %v475_v10, %v473_v8  ;;  %v478_v13 = vadd.f32 %v476_v11, %v474_v9  ;;  %vm606_vm13 = vcmask 257024  }
  0x15   : > { %454 = vst.msk [vmem:[#allocation2 + $0x30] sm:$0xff] %vm447_vm0, %v3052_v4  ;;  %455 = vst.msk [vmem:[#allocation2 + $0x38] sm:$0xff] %vm447_vm0, %v3052_v4  ;;  %vm547_vm3 = vcmp.ge.s32.totalorder %v545_v16, 8  ;;  %vm551_vm4 = vcmp.lt.s32.totalorder %v545_v16, 16  ;;  %v486_v18 = vsub.s32 0, %v485_v17  ;;  %vm548_vm5 = vcmp.ge.s32.totalorder %v545_v16, 16 }
  0x16   : > { %456 = vst.msk [vmem:[#allocation3] sm:$0xff] %vm447_vm0, %v3053_v5  ;;  %457 = vst.msk [vmem:[#allocation3 + $0x8] sm:$0xff] %vm447_vm0, %v3053_v5  ;;  %v479_v14 = vpack.c.bf16 %v478_v13, %v477_v12  ;;  %vm552_vm6 = vcmp.lt.s32.totalorder %v545_v16, 24  ;;  %vm549_vm7 = vcmp.ge.s32.totalorder %v545_v16, 24  ;;  %vm553_vm8 = vcmp.lt.s32.totalorder %v545_v16, 32 }
  0x17   : > { %458 = vst.msk [vmem:[#allocation3 + $0x10] sm:$0xff] %vm447_vm0, %v3053_v5  ;;  %459 = vst.msk [vmem:[#allocation3 + $0x18] sm:$0xff] %vm447_vm0, %v3053_v5  ;;  %2692 = vmatpush3.bf16.msra.mxu0 %v2897_v7  ;;  %v487_v19 = vrot.slane %v3148_v0, %v486_v18  ;;  %vm550_vm11 = vcmp.lt.s32.totalorder %v545_v16, 8 }
  0x18   : > { %460 = vst.msk [vmem:[#allocation3 + $0x20] sm:$0xff] %vm447_vm0, %v3053_v5  ;;  %461 = vst.msk [vmem:[#allocation3 + $0x28] sm:$0xff] %vm447_vm0, %v3053_v5  ;;  %v2517_v21 = vsel %vm550_vm11, 1.0, %v3053_v5 }
  0x19   : > { %462 = vst.msk [vmem:[#allocation3 + $0x30] sm:$0xff] %vm447_vm0, %v3053_v5  ;;  %463 = vst.msk [vmem:[#allocation3 + $0x38] sm:$0xff] %vm447_vm0, %v3053_v5 }
  0x1a   : > { %465 = vst.msk [vmem:[#allocation4] sm:$0xff] %vm464_vm2, %v3053_v5  ;;  %466 = vst.msk [vmem:[#allocation4 + $0x8] sm:$0xff] %vm464_vm2, %v3053_v5  ;;  %2694 = vmatmul.mubr.msk.bf16.vlgmr.msra.gmra.mxu0 %vm464_vm2, %v479_v14 }
  0x1b   : > { %467 = vst.msk [vmem:[#allocation4 + $0x10] sm:$0xff] %vm464_vm2, %v3053_v5  ;;  %468 = vst.msk [vmem:[#allocation4 + $0x18] sm:$0xff] %vm464_vm2, %v3053_v5 }
  0x1c   : > { %469 = vst.msk [vmem:[#allocation4 + $0x20] sm:$0xff] %vm464_vm2, %v3053_v5  ;;  %470 = vst.msk [vmem:[#allocation4 + $0x28] sm:$0xff] %vm464_vm2, %v3053_v5 }
  0x1d   : > { %471 = vst.msk [vmem:[#allocation4 + $0x30] sm:$0xff] %vm464_vm2, %v3053_v5  ;;  %472 = vst.msk [vmem:[#allocation4 + $0x38] sm:$0xff] %vm464_vm2, %v3053_v5 }
  0x1e   : > { %vm555_vm9 = vmand %vm547_vm3, %vm551_vm4 }
  0x1f   : > { %vm556_vm10 = vmand %vm548_vm5, %vm552_vm6  ;;  %v2518_v22 = vsel %vm555_vm9, 1.0, %v3053_v5 }
  0x20   : > { %vm557_vm12 = vmand %vm549_vm7, %vm553_vm8  ;;  %v2519_v23 = vsel %vm556_vm10, 1.0, %v3053_v5 }
  0x21   : > { %v2520_v24 = vsel %vm557_vm12, 1.0, %v3053_v5 }
  0xda   : > { %v537_v20 = vpop.f32.mrf.mxu0 }
  0xdb   : > { %v538_v25 = vadd.f32 %v537_v20, %v487_v19 }
  0xdc   : > { %v2695_v26 = vpop.f32.mrf.mxu0 }
  0xdd   : > { %v566_v27 = vmul.f32 %v2517_v21, %v538_v25  ;;  %v568_v28 = vmul.f32 %v2518_v22, %v538_v25  ;;  %v570_v29 = vmul.f32 %v2519_v23, %v538_v25  ;;  %v572_v30 = vmul.f32 %v2520_v24, %v538_v25 }
  0xde   : > { %v540_v31 = vpop.f32.mrf.mxu0 }
  0xdf   : > { %v2604_v32 = vpack.c.bf16 %v566_v27, %v566_v27  ;;  %v2606_v33 = vpack.c.bf16 %v568_v28, %v568_v28  ;;  %v2608_v34 = vpack.c.bf16 %v570_v29, %v570_v29  ;;  %v2610_v35 = vpack.c.bf16 %v572_v30, %v572_v30 }
  0xe0   : > { %v541_v36 = vadd.f32 %v540_v31, %v487_v19  ;;  %v2696_v37 = vpop.f32.mrf.mxu0 }
  0xe1   : > { %607 = vst.msk [vmem:[#allocation5] sm:$0xf] %vm606_vm13, %v2604_v32  ;;  %609 = vst.msk [vmem:[#allocation5 + $0x8] sm:$0xf] %vm606_vm13, %v2606_v33 }
  0xe2   : > { %611 = vst.msk [vmem:[#allocation5 + $0x10] sm:$0xf] %vm606_vm13, %v2608_v34  ;;  %613 = vst.msk [vmem:[#allocation5 + $0x18] sm:$0xf] %vm606_vm13, %v2610_v35  ;;  %v567_v38 = vmul.f32 %v2517_v21, %v541_v36  ;;  %v569_v39 = vmul.f32 %v2518_v22, %v541_v36  ;;  %v571_v40 = vmul.f32 %v2519_v23, %v541_v36 }
  0xe3   : > { %v573_v41 = vmul.f32 %v2520_v24, %v541_v36 }
  0xe4   : > { %v2605_v42 = vpack.c.bf16 %v567_v38, %v567_v38  ;;  %v2607_v43 = vpack.c.bf16 %v569_v39, %v569_v39  ;;  %v2609_v44 = vpack.c.bf16 %v571_v40, %v571_v40 }
  0xe5   : > { %v2611_v45 = vpack.c.bf16 %v573_v41, %v573_v41 }
  0xe6   : > { %608 = vst.msk [vmem:[#allocation5 + $0x4] sm:$0xf] %vm606_vm13, %v2605_v42  ;;  %610 = vst.msk [vmem:[#allocation5 + $0xc] sm:$0xf] %vm606_vm13, %v2607_v43 }
  0xe7   : > { %612 = vst.msk [vmem:[#allocation5 + $0x14] sm:$0xf] %vm606_vm13, %v2609_v44  ;;  %614 = vst.msk [vmem:[#allocation5 + $0x1c] sm:$0xf] %vm606_vm13, %v2611_v45 }
  0xe8 PF: > { %v3238_v46 = vld [vmem:[%s3759_s7 + $0x8] sm:$0xff]   ;;  %v3243_v47 = vld [vmem:[%s3759_s7] sm:$0xff]   ;;  %s3055_s13 = smov 96   ;;  %vm727_vm14 = vcmask 261120   ;;  %v3267_v59 = vld [vmem:[%s3175_s24 + $0x10] sm:$0xf] }
  0xe9   : > { %723 = vrot.lane.b32.xlu0 %v3238_v46, %s3055_s13  ;;  %v3247_v48 = vld [vmem:[%s3175_s24] sm:$0xf]  ;;  %v3250_v49 = vld [vmem:[%s3175_s24 + $0x4] sm:$0xf]  ;;  %v3259_v55 = vld [vmem:[%s3175_s24 + $0x8] sm:$0xf] }
  0xea   : > { %v635_v50 = vld [vmem:[%s3180_s27] sm:$0xf]  ;;  %v636_v51 = vld [vmem:[%s3180_s27 + $0x4] sm:$0xf]  ;;  %v3262_v56 = vld [vmem:[%s3175_s24 + $0xc] sm:$0xf] }
  0xeb   : > { %v651_v52 = vadd.bf16 %v635_v50, %v3247_v48  ;;  %v652_v53 = vadd.bf16 %v636_v51, %v3250_v49  ;;  %v637_v57 = vld [vmem:[%s3180_s27 + $0x8] sm:$0xf]  ;;  %v638_v58 = vld [vmem:[%s3180_s27 + $0xc] sm:$0xf]  ;;  %v3270_v60 = vld [vmem:[%s3175_s24 + $0x14] sm:$0xf]  ;;  %v2547_v51 = vcombine.low %v3247_v48, %v3250_v49 }
  0xec   : > { %v639_v61 = vld [vmem:[%s3180_s27 + $0x10] sm:$0xf]  ;;  %v640_v62 = vld [vmem:[%s3180_s27 + $0x14] sm:$0xf]  ;;  %v653_v4 = vadd.bf16 %v637_v57, %v3259_v55  ;;  %v654_v5 = vadd.bf16 %v638_v58, %v3262_v56  ;;  %v3279_v10 = vld [vmem:[%s3175_s24 + $0x18] sm:$0xf] }
  0xed   : > { %721 = vrot.lane.b32.xlu0 %v3243_v47, %s3055_s13  ;;  %v2529_v54 = vcombine.low %v651_v52, %v652_v53  ;;  %v655_v6 = vadd.bf16 %v639_v61, %v3267_v59  ;;  %v656_v7 = vadd.bf16 %v640_v62, %v3270_v60  ;;  %v3282_v11 = vld [vmem:[%s3175_s24 + $0x1c] sm:$0xf]  ;;  %v641_v13 = vld [vmem:[%s3180_s27 + $0x18] sm:$0xf]  ;;  %v3287_v15 = vld [vmem:[%s3175_s24 + $0x20] sm:$0xf]  ;;  %2721 = vmatprep.mubr.msk.bf16.mxu1 %vm727_vm14, %v2547_v51  ;;  %v667_v53 = vlaneseq }
  0xee   : > { %v2530_v9 = vcombine.low %v653_v4, %v654_v5  ;;  %v642_v14 = vld [vmem:[%s3180_s27 + $0x1c] sm:$0xf]  ;;  %v3290_v16 = vld [vmem:[%s3175_s24 + $0x24] sm:$0xf]  ;;  %v643_v17 = vld [vmem:[%s3180_s27 + $0x20] sm:$0xf]  ;;  %v657_v19 = vadd.bf16 %v641_v13, %v3279_v10 }
  0xef   : > { %2701 = vmatprep.mubr.msk.bf16.mxu0 %vm727_vm14, %v2529_v54  ;;  %v2531_v12 = vcombine.low %v655_v6, %v656_v7  ;;  %v644_v18 = vld [vmem:[%s3180_s27 + $0x24] sm:$0xf]  ;;  %v658_v20 = vadd.bf16 %v642_v14, %v3282_v11  ;;  %v659_v21 = vadd.bf16 %v643_v17, %v3287_v15  ;;  %v3301_v24 = vld [vmem:[%s3175_s24 + $0x28] sm:$0xf]  ;;  %v3304_v25 = vld [vmem:[%s3175_s24 + $0x2c] sm:$0xf] }
  0xf0   : > { %v660_v22 = vadd.bf16 %v644_v18, %v3290_v16  ;;  %v645_v27 = vld [vmem:[%s3180_s27 + $0x28] sm:$0xf]  ;;  %v646_v28 = vld [vmem:[%s3180_s27 + $0x2c] sm:$0xf]  ;;  %v3309_v29 = vld [vmem:[%s3175_s24 + $0x30] sm:$0xf] }
  0xf1   : > { %v2532_v23 = vcombine.low %v657_v19, %v658_v20  ;;  %v3312_v30 = vld [vmem:[%s3175_s24 + $0x34] sm:$0xf]  ;;  %v647_v31 = vld [vmem:[%s3180_s27 + $0x30] sm:$0xf]  ;;  %v661_v33 = vadd.bf16 %v645_v27, %v3301_v24  ;;  %v662_v34 = vadd.bf16 %v646_v28, %v3304_v25  ;;  %v3323_v38 = vld [vmem:[%s3175_s24 + $0x38] sm:$0xf] }
  0xf2   : > { %v2533_v26 = vcombine.low %v659_v21, %v660_v22  ;;  %v648_v32 = vld [vmem:[%s3180_s27 + $0x34] sm:$0xf]  ;;  %v663_v35 = vadd.bf16 %v647_v31, %v3309_v29  ;;  %v3326_v40 = vld [vmem:[%s3175_s24 + $0x3c] sm:$0xf]  ;;  %v649_v41 = vld [vmem:[%s3180_s27 + $0x38] sm:$0xf] }
  0xf3   : > { %v664_v36 = vadd.bf16 %v648_v32, %v3312_v30  ;;  %v2534_v37 = vcombine.low %v661_v33, %v662_v34  ;;  %v650_v42 = vld [vmem:[%s3180_s27 + $0x3c] sm:$0xf]  ;;  %v665_v43 = vadd.bf16 %v649_v41, %v3323_v38  ;;  %v2902_v50 = vld [vmem:[#allocation5] sm:$0xff]   ;;  %s3056_s24 = smov 64   ;;  %v3057_v52 = vmov 0   ;;  %p2572_p6 = scmp.ne.s32.totalorder %s3139_s22, 1 }
  0xf4   : > { %v666_v44 = vadd.bf16 %v650_v42, %v3326_v40  ;;  %895 = vrot.lane.b32.xlu1 %v3238_v46, %s3056_s24  ;;  %2898 = vset.pattern.permute.xlu0 %v3057_v52  ;;  %v3344_v54 = vshrl.u32 %v667_v53, 7  ;;  %vm1340_vm1 = vcmask 7168   ;;  %s3061_s14 = smov (!%p2572_p6), 32   ;;  %s3063_s28 = smov (!%p2572_p6), 64  }
  0xf5   : > { %v2535_v39 = vcombine.low %v663_v35, %v664_v36  ;;  %1159 = vperm.xlu0 %2898, %v3158_v2   ;;  %2899 = vset.pattern.permute.xlu1 %v3057_v52  ;;  %s3064_s27 = smov (!%p2572_p6), 96  }
  0xf6   : > { %v2536_v45 = vcombine.low %v665_v43, %v666_v44  ;;  %v669_v48 = vsub.s32 1, %v3344_v54 }
  0xf8   : > { %893 = vrot.lane.b32.xlu1 %v3243_v47, %s3056_s24  ;;  %v670_v57 = vrot.slane %v3148_v0, %v669_v48 }
  0xfc   : > { %1162 = vperm.xlu1 %2899, %v3163_v3  }
 0x15b   : > { %v724_v63 = vpop.permute.xlu0 %723 }
 0x15c   : > { %2697 = vmatprep.subr.bf16.mxu0 %v724_v63 }
 0x15d   : > { %2698 = vmatpush3.bf16.msra.mxu0 %v724_v63 }
 0x15f   : > { %v722_v8 = vpop.permute.xlu0 %721 }
 0x160   : > { %2699 = vmatprep.subr.bf16.mxu0 %v722_v8 }
 0x161   : > { %2700 = vmatpush3.bf16.msra.mxu0 %v722_v8 }
 0x164   : > { %2702 = vmatmul.mubr.msk.bf16.vlgmr.msra.gmra.mxu0 %vm727_vm14, %v2530_v9 }
 0x165   : > { %2705 = vmatprep.mubr.msk.bf16.mxu0 %vm727_vm14, %v2531_v12 }
 0x16c   : > { %2706 = vmatmul.mubr.msk.bf16.gmra.mxu0 %vm727_vm14, %v2532_v23 }
 0x16d   : > { %2709 = vmatprep.mubr.msk.bf16.mxu0 %vm727_vm14, %v2533_v26 }
 0x174   : > { %2710 = vmatmul.mubr.msk.bf16.gmra.mxu0 %vm727_vm14, %v2534_v37 }
 0x175   : > { %2713 = vmatprep.mubr.msk.bf16.mxu0 %vm727_vm14, %v2535_v39 }
 0x17c   : > { %2714 = vmatmul.mubr.msk.bf16.gmra.mxu0 %vm727_vm14, %v2536_v45 }
 0x17d   : > { %2753 = vmatprep.mubr.msk.bf16.mxu0 %vm727_vm14, %v2902_v50 }
 0x224   : > { %v2703_v49 = vpop.f32.mrf.mxu0 }
 0x225   : > { %v795_v61 = vadd.f32 %v2703_v49, %v670_v57 }
 0x226   : > { %v786_v58 = vpop.f32.mrf.mxu0 }
 0x227   : > { %v787_v4 = vadd.f32 %v786_v58, %v670_v57 }
 0x228   : > { %v2704_v2 = vpop.f32.mrf.mxu0 }
 0x229   : > { %v798_v62 = vadd.f32 %v2704_v2, %v670_v57 }
 0x22a   : > { %v789_v63 = vpop.f32.mrf.mxu0 }
 0x22b   : > { %v1029_v5 = vpack.c.bf16 %v798_v62, %v795_v61  ;;  %v790_v6 = vadd.f32 %v789_v63, %v670_v57 }
 0x22c   : > { %v2707_v3 = vpop.f32.mrf.mxu0 }
 0x22d   : > { %v1028_v7 = vpack.c.bf16 %v790_v6, %v787_v4  ;;  %v811_v45 = vadd.f32 %v2707_v3, %v670_v57  ;;  %v1072_v62 = vsel %vm727_vm14, %v1029_v5, 0  ;;  %v2903_v4 = vld [vmem:[#allocation5 + $0x8] sm:$0xff]   ;;  %v2904_v6 = vld [vmem:[#allocation5 + $0x10] sm:$0xff]  }
 0x22e   : > { %v802_v8 = vpop.f32.mrf.mxu0 }
 0x22f   : > { %v803_v49 = vadd.f32 %v802_v8, %v670_v57  ;;  %v1069_v63 = vsel %vm727_vm14, %v1028_v7, 0  ;;  %v2548_v8 = vcombine.low %v3259_v55, %v3262_v56  ;;  %v2551_v55 = vcombine.low %v3287_v15, %v3290_v16 }
 0x230   : > { %v2708_v9 = vpop.f32.mrf.mxu0  ;;  %v2552_v56 = vcombine.low %v3301_v24, %v3304_v25  ;;  %v3058_v24 = vmov 0.0  }
 0x231   : > { %v814_v44 = vadd.f32 %v2708_v9, %v670_v57  ;;  %v2550_v9 = vcombine.low %v3279_v10, %v3282_v11  ;;  %v2571_v10 = vld [vmem:[%s437_s17] ss:$0 sm:$0xff]  ;;  %v3395_v11 = vpop.permute.xlu0 %1159 }
 0x232   : > { %v805_v12 = vpop.f32.mrf.mxu0  ;;  %vm1168_vm15 = vcmp.ne.s32.totalorder %v3395_v11, %v2571_v10 }
 0x233   : > { %v1031_v50 = vpack.c.bf16 %v814_v44, %v811_v45  ;;  %v806_v52 = vadd.f32 %v805_v12, %v670_v57  ;;  %v1170_v25 = vsel %vm1168_vm15, -1e+09, %v3058_v24 }
 0x234   : > { %v2711_v13 = vpop.f32.mrf.mxu0 }
 0x235   : > { %v827_v35 = vadd.f32 %v2711_v13, %v670_v57  ;;  %v1030_v58 = vpack.c.bf16 %v806_v52, %v803_v49  ;;  %v1078_v2 = vsel %vm727_vm14, %v1031_v50, 0 }
 0x236   : > { %v818_v14 = vpop.f32.mrf.mxu0 }
 0x237   : > { %v819_v41 = vadd.f32 %v818_v14, %v670_v57  ;;  %v1075_v61 = vsel %vm727_vm14, %v1030_v58, 0 }
 0x238   : > { %v2712_v17 = vpop.f32.mrf.mxu0 }
 0x239   : > { %v830_v34 = vadd.f32 %v2712_v17, %v670_v57 }
 0x23a   : > { %v821_v18 = vpop.f32.mrf.mxu0 }
 0x23b   : > { %v1033_v36 = vpack.c.bf16 %v830_v34, %v827_v35  ;;  %v822_v39 = vadd.f32 %v821_v18, %v670_v57 }
 0x23c   : > { %v2715_v19 = vpop.f32.mrf.mxu0 }
 0x23d   : > { %v843_v22 = vadd.f32 %v2715_v19, %v670_v57  ;;  %v1032_v42 = vpack.c.bf16 %v822_v39, %v819_v41  ;;  %v1084_v43 = vsel %vm727_vm14, %v1033_v36, 0 }
 0x23e   : > { %v834_v20 = vpop.f32.mrf.mxu0 }
 0x23f   : > { %v835_v27 = vadd.f32 %v834_v20, %v670_v57  ;;  %v1081_v51 = vsel %vm727_vm14, %v1032_v42, 0 }
 0x240   : > { %v2716_v21 = vpop.f32.mrf.mxu0 }
 0x241   : > { %v846_v23 = vadd.f32 %v2716_v21, %v670_v57 }
 0x242   : > { %v837_v26 = vpop.f32.mrf.mxu0 }
 0x243   : > { %v1035_v28 = vpack.c.bf16 %v846_v23, %v843_v22  ;;  %v838_v31 = vadd.f32 %v837_v26, %v670_v57  ;;  %v896_v57 = vpop.permute.xlu1 %895 }
 0x244   : > { %2717 = vmatprep.subr.bf16.mxu1 %v896_v57 }
 0x245   : > { %v1034_v32 = vpack.c.bf16 %v838_v31, %v835_v27  ;;  %2857 = vmatprep.subr.msk.bf16.mxu0 %vm727_vm14, %v1035_v28  ;;  %v1090_v33 = vsel %vm727_vm14, %v1035_v28, 0  ;;  %2718 = vmatpush3.bf16.msra.mxu1 %v896_v57 }
 0x246   : > { %2738 = vmatpush3.bf16.xpose.msra.mxu0 %v1090_v33 }
 0x247   : > { %2858 = vmatprep.subr.msk.bf16.mxu0 %vm727_vm14, %v1034_v32  ;;  %v1087_v37 = vsel %vm727_vm14, %v1034_v32, 0  ;;  %v894_v3 = vpop.permute.xlu1 %893 }
 0x248   : > { %2719 = vmatprep.subr.bf16.mxu1 %v894_v3 }
 0x249   : > { %2720 = vmatpush3.bf16.msra.mxu1 %v894_v3 }
 0x24b   : > { %v3397_v15 = vpop.permute.xlu1 %1162 }
 0x24c   : > { %2722 = vmatmul.mubr.msk.bf16.vlgmr.msra.gmra.mxu1 %vm727_vm14, %v2548_v8  ;;  %vm1169_vm0 = vcmp.ne.s32.totalorder %v3397_v15, %v2571_v10 }
 0x24e   : > { %2740 = vmatpush3.bf16.xpose.msra.mxu0 %v1087_v37 }
 0x24f   : > { %2859 = vmatprep.subr.msk.bf16.mxu0 %vm727_vm14, %v1033_v36 }
 0x256   : > { %2742 = vmatpush3.bf16.xpose.msra.mxu0 %v1084_v43 }
 0x257   : > { %2860 = vmatprep.subr.msk.bf16.mxu0 %vm727_vm14, %v1032_v42  ;;  %v851_v42 = vsub.s32 2, %v3344_v54 }
 0x259   : > { %v852_v45 = vrot.slane %v3148_v0, %v851_v42 }
 0x25e   : > { %2744 = vmatpush3.bf16.xpose.msra.mxu0 %v1081_v51 }
 0x25f   : > { %2861 = vmatprep.subr.msk.bf16.mxu0 %vm727_vm14, %v1031_v50 }
 0x266   : > { %2746 = vmatpush3.bf16.xpose.msra.mxu0 %v1078_v2 }
 0x267   : > { %2862 = vmatprep.subr.msk.bf16.mxu0 %vm727_vm14, %v1030_v58 }
 0x26e   : > { %2748 = vmatpush3.bf16.xpose.msra.mxu0 %v1075_v61 }
 0x26f   : > { %2863 = vmatprep.subr.msk.bf16.mxu0 %vm727_vm14, %v1029_v5  ;;  %v2549_v5 = vcombine.low %v3267_v59, %v3270_v60  ;;  %v2553_v59 = vcombine.low %v3309_v29, %v3312_v30  ;;  %v2554_v60 = vcombine.low %v3323_v38, %v3326_v40  ;;  %v1171_v38 = vsel %vm1169_vm0, -1e+09, %v3058_v24 }
 0x271   : > { %2725 = vmatprep.mubr.msk.bf16.mxu1 %vm727_vm14, %v2549_v5 }
 0x272   : > { %2726 = vmatmul.mubr.msk.bf16.gmra.mxu1 %vm727_vm14, %v2550_v9 }
 0x273   : > { %2729 = vmatprep.mubr.msk.bf16.mxu1 %vm727_vm14, %v2551_v55 }
 0x276   : > { %2750 = vmatpush3.bf16.xpose.msra.mxu0 %v1072_v62 }
 0x277   : > { %2864 = vmatprep.subr.msk.bf16.mxu0 %vm727_vm14, %v1028_v7  ;;  %v2905_v7 = vld [vmem:[#allocation5 + $0x18] sm:$0xff]  }
 0x27a   : > { %2730 = vmatmul.mubr.msk.bf16.gmra.mxu1 %vm727_vm14, %v2552_v56 }
 0x27b   : > { %2733 = vmatprep.mubr.msk.bf16.mxu1 %vm727_vm14, %v2553_v59 }
 0x27e   : > { %2752 = vmatpush3.bf16.xpose.msra.mxu0 %v1069_v63 }
 0x282   : > { %2734 = vmatmul.mubr.msk.bf16.gmra.mxu1 %vm727_vm14, %v2554_v60 }
 0x285   : > { %2754 = vmatmul.mubr.msk.bf16.vlgmr.msra.gmra.mxu0 %vm727_vm14, %v2903_v4 }
 0x286   : > { %2757 = vmatprep.mubr.msk.bf16.mxu0 %vm727_vm14, %v2904_v6 }
 0x28d   : > { %2758 = vmatmul.mubr.msk.bf16.gmra.mxu0 %vm727_vm14, %v2905_v7 }
 0x30c   : > { %v2723_v28 = vpop.f32.mrf.mxu1 }
 0x30d   : > { %v966_v10 = vadd.f32 %v2723_v28, %v852_v45 }
 0x30e   : > { %v957_v31 = vpop.f32.mrf.mxu1 }
 0x310   : > { %v2724_v32 = vpop.f32.mrf.mxu1 }
 0x312   : > { %v960_v33 = vpop.f32.mrf.mxu1 }
 0x332   : > { %v2727_v34 = vpop.f32.mrf.mxu1 }
 0x333   : > { %v982_v7 = vadd.f32 %v2727_v34, %v852_v45 }
 0x334   : > { %v973_v35 = vpop.f32.mrf.mxu1 }
 0x335   : > { %v974_v56 = vadd.f32 %v973_v35, %v852_v45 }
 0x336   : > { %v2728_v36 = vpop.f32.mrf.mxu1 }
 0x337   : > { %v985_v9 = vadd.f32 %v2728_v36, %v852_v45  ;;  %v1182_v36 = vld [vmem:[#allocation2 + $0x10] sm:$0xff] }
 0x338   : > { %v976_v37 = vpop.f32.mrf.mxu1 }
 0x339   : > { %v1412_v59 = vpack.c.bf16 %v985_v9, %v982_v7  ;;  %v977_v60 = vadd.f32 %v976_v37, %v852_v45 }
 0x33a   : > { %v2731_v39 = vpop.f32.mrf.mxu1 }
 0x33b   : > { %v998_v62 = vadd.f32 %v2731_v39, %v852_v45  ;;  %v1411_v24 = vpack.c.bf16 %v977_v60, %v974_v56 }
 0x33c   : > { %v989_v41 = vpop.f32.mrf.mxu1 }
 0x33d   : > { %v990_v3 = vadd.f32 %v989_v41, %v852_v45 }
 0x33e   : > { %v2732_v43 = vpop.f32.mrf.mxu1 }
 0x33f   : > { %v1001_v63 = vadd.f32 %v2732_v43, %v852_v45 }
 0x340   : > { %v992_v44 = vpop.f32.mrf.mxu1 }
 0x341   : > { %v1414_v8 = vpack.c.bf16 %v1001_v63, %v998_v62  ;;  %v993_v5 = vadd.f32 %v992_v44, %v852_v45  ;;  %v1184_v44 = vld [vmem:[#allocation2 + $0x20] sm:$0xff]  ;;  %v3433_v62 = vld [vmem:[#allocation2 + $0x30] sm:$0xff]  ;;  %v3435_v63 = vld [vmem:[#allocation2 + $0x38] sm:$0xff] }
 0x342   : > { %v2735_v50 = vpop.f32.mrf.mxu1 }
 0x343   : > { %v1014_v52 = vadd.f32 %v2735_v50, %v852_v45  ;;  %v1413_v55 = vpack.c.bf16 %v993_v5, %v990_v3 }
 0x344   : > { %v1005_v51 = vpop.f32.mrf.mxu1 }
 0x345   : > { %v2755_v16 = vpop.f32.mrf.mxu0  ;;  %v1006_v58 = vadd.f32 %v1005_v51, %v852_v45 }
 0x346   : > { %v3410_v19 = vadd.f32 %v2755_v16, %v1170_v25  ;;  %v2736_v49 = vpop.f32.mrf.mxu1  ;;  %v969_v16 = vadd.f32 %v2724_v32, %v852_v45 }
 0x347   : > { %v1126_v29 = vpop.f32.mrf.mxu0  ;;  %v1017_v2 = vadd.f32 %v2736_v49, %v852_v45 }
 0x348   : > { %v3401_v30 = vadd.f32 %v1170_v25, %v1126_v29  ;;  %v1008_v61 = vpop.f32.mrf.mxu1  ;;  %v1410_v29 = vpack.c.bf16 %v969_v16, %v966_v10 }
 0x349   : > { %v2756_v40 = vpop.f32.mrf.mxu0  ;;  %v1416_v57 = vpack.c.bf16 %v1017_v2, %v1014_v52  ;;  %v1009_v4 = vadd.f32 %v1008_v61, %v852_v45 }
 0x34a   : > { %1188 = vmax.xlane.f32.xlu1 %v3401_v30  ;;  %v3404_v13 = vadd.f32 %v2756_v40, %v1171_v38 }
 0x34b   : > { %v1129_v12 = vpop.f32.mrf.mxu0  ;;  %v1415_v6 = vpack.c.bf16 %v1009_v4, %v1006_v58  ;;  %2761 = vmatprep.subr.bf16.mxu1 %v1416_v57 }
 0x34c   : > { %v3406_v14 = vadd.f32 %v1171_v38, %v1129_v12  ;;  %2762 = vmatpush3.bf16.msra.mxu1 %v1416_v57  ;;  %v1180_v12 = vld [vmem:[#allocation2] sm:$0xff] }
 0x34d   : > { %v2759_v17 = vpop.f32.mrf.mxu0  ;;  %2763 = vmatprep.subr.bf16.mxu1 %v1415_v6 }
 0x34e   : > { %1194 = vmax.xlane.f32.xlu1 %v3404_v13  ;;  %1190 = vmax.xlane.f32.xlu0 %v3406_v14  ;;  %v3419_v26 = vadd.f32 %v2759_v17, %v1170_v25 }
 0x34f   : > { %v1142_v18 = vpop.f32.mrf.mxu0 }
 0x350   : > { %v3413_v22 = vadd.f32 %v1170_v25, %v1142_v18  ;;  %2764 = vmatpush3.bf16.msra.mxu1 %v1415_v6  ;;  %v958_v25 = vadd.f32 %v957_v31, %v852_v45 }
 0x351   : > { %v2760_v20 = vpop.f32.mrf.mxu0  ;;  %2765 = vmatprep.subr.bf16.mxu1 %v1414_v8 }
 0x352   : > { %1192 = vmax.xlane.f32.xlu0 %v3410_v19  ;;  %v3421_v27 = vadd.f32 %v2760_v20, %v1171_v38  ;;  %v1183_v20 = vld [vmem:[#allocation2 + $0x18] sm:$0xff] }
 0x353   : > { %v1145_v21 = vpop.f32.mrf.mxu0 }
 0x354   : > { %v3415_v23 = vadd.f32 %v1171_v38, %v1145_v21  ;;  %2766 = vmatpush3.bf16.msra.mxu1 %v1414_v8  ;;  %v961_v38 = vadd.f32 %v960_v33, %v852_v45  ;;  %v1181_v21 = vld [vmem:[#allocation2 + $0x8] sm:$0xff] }
 0x355   : > { %2767 = vmatprep.subr.bf16.mxu1 %v1413_v55  ;;  %v1185_v45 = vld [vmem:[#allocation2 + $0x28] sm:$0xff] }
 0x356   : > { %1196 = vmax.xlane.f32.xlu0 %v3413_v22  ;;  %1198 = vmax.xlane.f32.xlu1 %v3415_v23  ;;  %v1409_v40 = vpack.c.bf16 %v961_v38, %v958_v25 }
 0x358   : > { %2768 = vmatpush3.bf16.msra.mxu1 %v1413_v55 }
 0x359   : > { %2769 = vmatprep.subr.bf16.mxu1 %v1412_v59 }
 0x35a   : > { %1200 = vmax.xlane.f32.xlu0 %v3419_v26  ;;  %1202 = vmax.xlane.f32.xlu1 %v3421_v27 }
 0x35c   : > { %2770 = vmatpush3.bf16.msra.mxu1 %v1412_v59 }
 0x35d   : > { %2771 = vmatprep.subr.bf16.mxu1 %v1411_v24 }
 0x360   : > { %2772 = vmatpush3.bf16.msra.mxu1 %v1411_v24 }
 0x361   : > { %2773 = vmatprep.subr.bf16.mxu1 %v1410_v29 }
 0x364   : > { %2774 = vmatpush3.bf16.msra.mxu1 %v1410_v29 }
 0x365   : > { %2775 = vmatprep.subr.bf16.mxu1 %v1409_v40 }
 0x368   : > { %2776 = vmatpush3.bf16.msra.mxu1 %v1409_v40 }
 0x3d3   : > { %v1189_v17 = vpop.xlane.xlu1 %1188 }
 0x3d4   : > { %v1204_v18 = vmax.f32 %v1180_v12, %v1189_v17 }
 0x3d6   : > { %v1212_v28 = vsub.f32 %v1180_v12, %v1204_v18  ;;  %1498 = vst.msk [vmem:[#allocation2] sm:$0xff] %vm1340_vm1, %v1204_v18  ;;  %1238 = vperm.xlu0 %2898, %v1204_v18  }
 0x3d7   : > { %v1195_v31 = vpop.xlane.xlu1 %1194  ;;  %v1191_v32 = vpop.xlane.xlu0 %1190 }
 0x3d8   : > { %v1220_v33 = vmul.f32 1.442695, %v1212_v28  ;;  %v1207_v34 = vmax.f32 %v1183_v20, %v1195_v31  ;;  %v1205_v35 = vmax.f32 %v1181_v21, %v1191_v32 }
 0x3da   : > { %v1215_v37 = vsub.f32 %v1183_v20, %v1207_v34  ;;  %1501 = vst.msk [vmem:[#allocation2 + $0x18] sm:$0xff] %vm1340_vm1, %v1207_v34  ;;  %1499 = vst.msk [vmem:[#allocation2 + $0x8] sm:$0xff] %vm1340_vm1, %v1205_v35  ;;  %1253 = vperm.xlu0 %2898, %v1207_v34   ;;  %1243 = vperm.xlu1 %2899, %v1205_v35   ;;  %2914 = vpow2.f32 %v1220_v33  ;;  %v1213_v50 = vsub.f32 %v1181_v21, %v1205_v35 }
 0x3db   : > { %v1193_v39 = vpop.xlane.xlu0 %1192 }
 0x3dc   : > { %v1226_v41 = vmul.f32 1.442695, %v1215_v37  ;;  %v1206_v43 = vmax.f32 %v1182_v36, %v1193_v39  ;;  %v1222_v57 = vmul.f32 1.442695, %v1213_v50 }
 0x3de   : > { %v1214_v51 = vsub.f32 %v1182_v36, %v1206_v43  ;;  %1500 = vst.msk [vmem:[#allocation2 + $0x10] sm:$0xff] %vm1340_vm1, %v1206_v43  ;;  %1248 = vperm.xlu1 %2899, %v1206_v43   ;;  %2916 = vpow2.f32 %v1226_v41 }
 0x3df   : > { %v1197_v52 = vpop.xlane.xlu0 %1196  ;;  %v1199_v49 = vpop.xlane.xlu1 %1198 }
 0x3e0   : > { %v1224_v58 = vmul.f32 1.442695, %v1214_v51  ;;  %v1208_v2 = vmax.f32 %v1184_v44, %v1197_v52  ;;  %v1209_v61 = vmax.f32 %v1185_v45, %v1199_v49 }
 0x3e2   : > { %2918 = vpow2.f32 %v1224_v58  ;;  %v1216_v4 = vsub.f32 %v1184_v44, %v1208_v2  ;;  %1502 = vst.msk [vmem:[#allocation2 + $0x20] sm:$0xff] %vm1340_vm1, %v1208_v2  ;;  %v1217_v6 = vsub.f32 %v1185_v45, %v1209_v61  ;;  %1503 = vst.msk [vmem:[#allocation2 + $0x28] sm:$0xff] %vm1340_vm1, %v1209_v61  ;;  %1258 = vperm.xlu1 %2899, %v1208_v2   ;;  %1263 = vperm.xlu0 %2898, %v1209_v61  }
 0x3e3   : > { %v1201_v3 = vpop.xlane.xlu0 %1200  ;;  %v1203_v8 = vpop.xlane.xlu1 %1202  ;;  %2920 = vpow2.f32 %v1222_v57 }
 0x3e4   : > { %v1230_v5 = vmul.f32 1.442695, %v1217_v6  ;;  %v3440_v7 = vmax.f32 %v3433_v62, %v1201_v3  ;;  %v3443_v9 = vmax.f32 %v3435_v63, %v1203_v8  ;;  %v1228_v55 = vmul.f32 1.442695, %v1216_v4 }
 0x3e6   : > { %v1218_v56 = vsub.f32 %v3433_v62, %v3440_v7  ;;  %1504 = vst.msk [vmem:[#allocation2 + $0x30] sm:$0xff] %vm1340_vm1, %v3440_v7  ;;  %v1219_v59 = vsub.f32 %v3435_v63, %v3443_v9  ;;  %1505 = vst.msk [vmem:[#allocation2 + $0x38] sm:$0xff] %vm1340_vm1, %v3443_v9  ;;  %1268 = vperm.xlu1 %2899, %v3440_v7   ;;  %1273 = vperm.xlu0 %2898, %v3443_v9   ;;  %2922 = vpow2.f32 %v1230_v5  ;;  %v1300_v62 = vld [vmem:[#allocation3] sm:$0xff] }
 0x3e7   : > { %v3455_v60 = vpop.eup %2914  ;;  %2924 = vpow2.f32 %v1228_v55 }
 0x3e8   : > { %v1232_v4 = vmul.f32 1.442695, %v1218_v56  ;;  %v1234_v6 = vmul.f32 1.442695, %v1219_v59  ;;  %v1308_v7 = vmul.f32 %v3455_v60, %v1300_v62 }
 0x3ea   : > { %1359 = vperm.xlu0 %2898, %v3455_v60  }
 0x3eb   : > { %v3458_v10 = vpop.eup %2916 }
 0x3ee   : > { %1374 = vperm.xlu0 %2898, %v3458_v10  }
 0x3ef   : > { %v3461_v16 = vpop.eup %2918 }
 0x3f0   : > { %1369 = vperm.xlu1 %2899, %v3461_v16   ;;  %v3464_v24 = vpop.eup %2920 }
 0x3f3   : > { %v3466_v25 = vpop.eup %2922 }
 0x3f4   : > { %1364 = vperm.xlu1 %2899, %v3464_v24   ;;  %1384 = vperm.xlu0 %2898, %v3466_v25   ;;  %v3470_v29 = vpop.eup %2924 }
 0x3f8   : > { %1379 = vperm.xlu1 %2899, %v3470_v29  }
 0x451   : > { %v1239_v38 = vpop.permute.xlu0 %1238 }
 0x452   : > { %v1276_v40 = vsub.f32 %v3401_v30, %v1239_v38 }
 0x454   : > { %v1284_v12 = vmul.f32 1.442695, %v1276_v40 }
 0x455   : > { %v1254_v17 = vpop.permute.xlu0 %1253  ;;  %v1244_v18 = vpop.permute.xlu1 %1243 }
 0x456   : > { %2926 = vpow2.f32 %v1284_v12  ;;  %v1279_v20 = vsub.f32 %v3404_v13, %v1254_v17  ;;  %v1277_v21 = vsub.f32 %v3406_v14, %v1244_v18  ;;  %v1303_v17 = vld [vmem:[#allocation3 + $0x18] sm:$0xff] }
 0x457   : > { %v1311_v63 = vmul.f32 %v3458_v10, %v1303_v17  ;;  %v1306_v10 = vld [vmem:[#allocation3 + $0x30] sm:$0xff] }
 0x458   : > { %v1290_v28 = vmul.f32 1.442695, %v1279_v20  ;;  %v1286_v31 = vmul.f32 1.442695, %v1277_v21  ;;  %v1302_v20 = vld [vmem:[#allocation3 + $0x10] sm:$0xff] }
 0x459   : > { %v1249_v32 = vpop.permute.xlu1 %1248 }
 0x45a   : > { %2928 = vpow2.f32 %v1290_v28  ;;  %v1278_v33 = vsub.f32 %v3410_v19, %v1249_v32  ;;  %v1310_v28 = vmul.f32 %v3461_v16, %v1302_v20  ;;  %v1301_v32 = vld [vmem:[#allocation3 + $0x8] sm:$0xff]  ;;  %v1304_v16 = vld [vmem:[#allocation3 + $0x20] sm:$0xff] }
 0x45b   : > { %2930 = vpow2.f32 %v1286_v31 }
 0x45c   : > { %v1288_v34 = vmul.f32 1.442695, %v1278_v33  ;;  %v1309_v33 = vmul.f32 %v3464_v24, %v1301_v32  ;;  %v1312_v24 = vmul.f32 %v3470_v29, %v1304_v16 }
 0x45d   : > { %v1264_v35 = vpop.permute.xlu0 %1263  ;;  %v1259_v36 = vpop.permute.xlu1 %1258 }
 0x45e   : > { %2932 = vpow2.f32 %v1288_v34  ;;  %v1281_v30 = vsub.f32 %v3415_v23, %v1264_v35  ;;  %v1280_v37 = vsub.f32 %v3413_v22, %v1259_v36  ;;  %v1307_v35 = vld [vmem:[#allocation3 + $0x38] sm:$0xff] }
 0x460   : > { %v1294_v39 = vmul.f32 1.442695, %v1281_v30  ;;  %v1292_v41 = vmul.f32 1.442695, %v1280_v37 }
 0x461   : > { %v1274_v13 = vpop.permute.xlu0 %1273  ;;  %v1269_v43 = vpop.permute.xlu1 %1268 }
 0x462   : > { %2934 = vpow2.f32 %v1294_v39  ;;  %v1283_v14 = vsub.f32 %v3421_v27, %v1274_v13  ;;  %v1282_v44 = vsub.f32 %v3419_v26, %v1269_v43 }
 0x463   : > { %v2927_v45 = vpop.eup %2926  ;;  %2936 = vpow2.f32 %v1292_v41  ;;  %v1305_v41 = vld [vmem:[#allocation3 + $0x28] sm:$0xff] }
 0x464   : > { %v1298_v19 = vmul.f32 1.442695, %v1283_v14  ;;  %v1296_v50 = vmul.f32 1.442695, %v1282_v44  ;;  %1316 = vadd.xlane.f32.xlu1 %v2927_v45  ;;  %v1313_v44 = vmul.f32 %v3466_v25, %v1305_v41  ;;  %v1350_v25 = vld [vmem:[#allocation4 + $0x8] sm:$0xff] }
 0x465   : > { %v1360_v38 = vpop.permute.xlu0 %1359 }
 0x466   : > { %2938 = vpow2.f32 %v1298_v19 }
 0x467   : > { %v2929_v51 = vpop.eup %2928  ;;  %2940 = vpow2.f32 %v1296_v50 }
 0x468   : > { %v2931_v23 = vpop.eup %2930  ;;  %1322 = vadd.xlane.f32.xlu1 %v2929_v51  ;;  %2942 = vpow2.f32 %v1232_v4 }
 0x469   : > { %v1405_v22 = vpack.c.bf16 %v2931_v23, %v2927_v45  ;;  %2944 = vpow2.f32 %v1234_v6  ;;  %v1375_v56 = vpop.permute.xlu0 %1374  ;;  %v1355_v6 = vld [vmem:[#allocation4 + $0x30] sm:$0xff] }
 0x46b   : > { %v2933_v52 = vpop.eup %2932  ;;  %2777 = vmatprep.mubr.bf16.mxu1 %v1405_v22  ;;  %v1370_v5 = vpop.permute.xlu1 %1369  ;;  %v1349_v22 = vld [vmem:[#allocation4] sm:$0xff] }
 0x46c   : > { %1320 = vadd.xlane.f32.xlu0 %v2933_v52  ;;  %v1406_v49 = vpack.c.bf16 %v2929_v51, %v2933_v52 }
 0x46e   : > { %2778 = vmatmul.mubr.bf16.vlgmr.msra.gmra.mxu1 %v1406_v49  ;;  %v1352_v49 = vld [vmem:[#allocation4 + $0x18] sm:$0xff] }
 0x46f   : > { %v2935_v58 = vpop.eup %2934  ;;  %v1365_v55 = vpop.permute.xlu1 %1364 }
 0x470   : > { %v2937_v27 = vpop.eup %2936  ;;  %1318 = vadd.xlane.f32.xlu0 %v2931_v23  ;;  %v3492_v9 = vpop.permute.xlu0 %1384  ;;  %v1351_v23 = vld [vmem:[#allocation4 + $0x10] sm:$0xff]  ;;  %v1398_v4 = vmul.f32 %v1365_v55, %v1350_v25  ;;  %v1354_v55 = vld [vmem:[#allocation4 + $0x28] sm:$0xff] }
 0x471   : > { %v1407_v26 = vpack.c.bf16 %v2935_v58, %v2937_v27  ;;  %v1399_v52 = vmul.f32 %v1370_v5, %v1351_v23 }
 0x473   : > { %v2939_v2 = vpop.eup %2938  ;;  %2781 = vmatprep.mubr.bf16.mxu1 %v1407_v26  ;;  %v3487_v40 = vpop.permute.xlu1 %1379 }
 0x474   : > { %v2941_v61 = vpop.eup %2940  ;;  %1330 = vadd.xlane.f32.xlu1 %v2939_v2 }
 0x475   : > { %1328 = vadd.xlane.f32.xlu0 %v2941_v61  ;;  %v1408_v57 = vpack.c.bf16 %v2939_v2, %v2941_v61  ;;  %v2943_v3 = vpop.eup %2942  ;;  %v1400_v61 = vmul.f32 %v1375_v56, %v1352_v49 }
 0x476   : > { %v2945_v8 = vpop.eup %2944  ;;  %v1314_v37 = vmul.f32 %v2943_v3, %v1306_v10 }
 0x477   : > { %2782 = vmatmul.mubr.bf16.gmra.mxu1 %v1408_v57  ;;  %v1315_v30 = vmul.f32 %v2945_v8, %v1307_v35 }
 0x478   : > { %1326 = vadd.xlane.f32.xlu1 %v2935_v58 }
 0x479   : > { %1324 = vadd.xlane.f32.xlu0 %v2937_v27  ;;  %v1397_v27 = vmul.f32 %v1360_v38, %v1349_v22 }
 0x489   : > { %1389 = vperm.xlu1 %2899, %v2943_v3  }
 0x48f   : > { %1394 = vperm.xlu0 %2898, %v2945_v8  }
 0x4ed   : > { %v1317_v12 = vpop.xlane.xlu1 %1316 }
 0x4ee   : > { %v1332_v18 = vadd.f32 %v1317_v12, %v1308_v7  ;;  %v1353_v7 = vld [vmem:[#allocation4 + $0x20] sm:$0xff]  ;;  %v1356_v12 = vld [vmem:[#allocation4 + $0x38] sm:$0xff] }
 0x4f0   : > { %1341 = vst.msk [vmem:[#allocation3] sm:$0xff] %vm1340_vm1, %v1332_v18  ;;  %v1401_v18 = vmul.f32 %v3487_v40, %v1353_v7 }
 0x4f1   : > { %v1323_v59 = vpop.xlane.xlu1 %1322 }
 0x4f2   : > { %v1335_v21 = vadd.f32 %v1323_v59, %v1311_v63 }
 0x4f4   : > { %1344 = vst.msk [vmem:[#allocation3 + $0x18] sm:$0xff] %vm1340_vm1, %v1335_v21 }
 0x4f5   : > { %v1321_v31 = vpop.xlane.xlu0 %1320 }
 0x4f6   : > { %v1334_v60 = vadd.f32 %v1321_v31, %v1310_v28  ;;  %v1402_v31 = vmul.f32 %v3492_v9, %v1354_v55 }
 0x4f8   : > { %1343 = vst.msk [vmem:[#allocation3 + $0x10] sm:$0xff] %vm1340_vm1, %v1334_v60 }
 0x4f9   : > { %v1319_v34 = vpop.xlane.xlu0 %1318 }
 0x4fa   : > { %v1333_v36 = vadd.f32 %v1319_v34, %v1309_v33 }
 0x4fc   : > { %1342 = vst.msk [vmem:[#allocation3 + $0x8] sm:$0xff] %vm1340_vm1, %v1333_v36 }
 0x4fd   : > { %v1331_v39 = vpop.xlane.xlu1 %1330 }
 0x4fe   : > { %v1329_v13 = vpop.xlane.xlu0 %1328  ;;  %v1339_v43 = vadd.f32 %v1331_v39, %v1315_v30 }
 0x4ff   : > { %v1338_v14 = vadd.f32 %v1329_v13, %v1314_v37 }
 0x500   : > { %1348 = vst.msk [vmem:[#allocation3 + $0x38] sm:$0xff] %vm1340_vm1, %v1339_v43 }
 0x501   : > { %1347 = vst.msk [vmem:[#allocation3 + $0x30] sm:$0xff] %vm1340_vm1, %v1338_v14  ;;  %v1327_v45 = vpop.xlane.xlu1 %1326 }
 0x502   : > { %v1325_v19 = vpop.xlane.xlu0 %1324  ;;  %v1337_v50 = vadd.f32 %v1327_v45, %v1313_v44 }
 0x503   : > { %v1336_v51 = vadd.f32 %v1325_v19, %v1312_v24 }
 0x504   : > { %1346 = vst.msk [vmem:[#allocation3 + $0x28] sm:$0xff] %vm1340_vm1, %v1337_v50 }
 0x505   : > { %1345 = vst.msk [vmem:[#allocation3 + $0x20] sm:$0xff] %vm1340_vm1, %v1336_v51  ;;  %v1390_v3 = vpop.permute.xlu1 %1389 }
 0x506   : > { %v1403_v38 = vmul.f32 %v1390_v3, %v1355_v6 }
 0x50a   : > { %v1395_v17 = vpop.permute.xlu0 %1394 }
 0x50b   : > { %v1404_v20 = vmul.f32 %v1395_v17, %v1356_v12 }
 0x52e   : > { %v2779_v58 = vpop.f32.mrf.mxu1 }
 0x52f   : > { %v1484_v26 = vadd.f32 %v2779_v58, %v1399_v52 }
 0x530   : > { %v1451_v2 = vpop.f32.mrf.mxu1 }
 0x531   : > { %1492 = vst.msk [vmem:[#allocation4 + $0x10] sm:$0xff] %vm727_vm14, %v1484_v26  ;;  %v1482_v29 = vadd.f32 %v1451_v2, %v1397_v27 }
 0x532   : > { %v2780_v57 = vpop.f32.mrf.mxu1 }
 0x533   : > { %1490 = vst.msk [vmem:[#allocation4] sm:$0xff] %vm727_vm14, %v1482_v29  ;;  %v1485_v8 = vadd.f32 %v2780_v57, %v1400_v61 }
 0x534   : > { %v1454_v62 = vpop.f32.mrf.mxu1 }
 0x535   : > { %1493 = vst.msk [vmem:[#allocation4 + $0x18] sm:$0xff] %vm727_vm14, %v1485_v8  ;;  %v1483_v5 = vadd.f32 %v1454_v62, %v1398_v4 }
 0x537   : > { %1491 = vst.msk [vmem:[#allocation4 + $0x8] sm:$0xff] %vm727_vm14, %v1483_v5  ;;  %v2783_v56 = vpop.f32.mrf.mxu1 }
 0x538   : > { %v1488_v63 = vadd.f32 %v2783_v56, %v1403_v38 }
 0x539   : > { %v1467_v59 = vpop.f32.mrf.mxu1 }
 0x53a   : > { %1496 = vst.msk [vmem:[#allocation4 + $0x30] sm:$0xff] %vm727_vm14, %v1488_v63  ;;  %v1486_v21 = vadd.f32 %v1467_v59, %v1401_v18 }
 0x53b   : > { %v2784_v28 = vpop.f32.mrf.mxu1 }
 0x53c   : > { %1494 = vst.msk [vmem:[#allocation4 + $0x20] sm:$0xff] %vm727_vm14, %v1486_v21  ;;  %v1489_v32 = vadd.f32 %v2784_v28, %v1404_v20  ;;  %1509 = sbr.rel (%p2572_p6) target bundleno = 4304 (0x10d0), region = 76 }
 0x53d   : > { %v1470_v60 = vpop.f32.mrf.mxu1 }
 0x53e   : > { %1497 = vst.msk [vmem:[#allocation4 + $0x38] sm:$0xff] %vm727_vm14, %v1489_v32  ;;  %v1487_v33 = vadd.f32 %v1470_v60, %v1402_v31 }
 0x540   : > { %1495 = vst.msk [vmem:[#allocation4 + $0x28] sm:$0xff] %vm727_vm14, %v1487_v33 }
 0x541   : > { %v1554_v40 = vld [vmem:[#allocation3 + $0x10] sm:$0xff]  ;;  %v1552_v34 = vld [vmem:[#allocation3] sm:$0xff]  ;;  %v1555_v35 = vld [vmem:[#allocation3 + $0x18] sm:$0xff]  ;;  %v3059_v36 = vmov 0   ;;  %v3060_v41 = vmov 0.0   ;;  %vm3062_vm2 = vmmov 0  }
 0x542   : > { %2947 = vset.pattern.permute.xlu1 %v3059_v36  ;;  %2946 = vset.pattern.permute.xlu0 %v3059_v36  ;;  %2956 = vrcp.f32 %v1554_v40  ;;  %v1553_v9 = vld [vmem:[#allocation3 + $0x8] sm:$0xff]  ;;  %v1556_v30 = vld [vmem:[#allocation3 + $0x20] sm:$0xff]  ;;  %v1559_v37 = vld [vmem:[#allocation3 + $0x38] sm:$0xff]  ;;  %v1511_v50 = vand.u32 127, %v667_v53  ;;  %vm1965_vm0 = vcmask 130048   ;;  %vm2349_vm1 = vcmask 523264  }
 0x543   : > { %2958 = vrcp.f32 %v1552_v34  ;;  %v1557_v10 = vld [vmem:[#allocation3 + $0x28] sm:$0xff]  ;;  %v1558_v39 = vld [vmem:[#allocation3 + $0x30] sm:$0xff]  ;;  %2785 = vmatprep.subr.bf16.mxu0 %v3060_v41  ;;  %2793 = vmatprep.subr.bf16.mxu1 %v3060_v41  ;;  %v1536_v22 = vld [vmem:[#allocation4] sm:$0xff] }
 0x544   : > { %2960 = vrcp.f32 %v1555_v35  ;;  %2789 = vmatprep.mubr.msk.bf16.mxu0 %vm3062_vm2, %v3060_v41  ;;  %2797 = vmatprep.mubr.msk.bf16.mxu1 %vm3062_vm2, %v3060_v41  ;;  %vm1513_vm3 = vcmp.ge.s32.totalorder %v1511_v50, 8  ;;  %vm1517_vm4 = vcmp.lt.s32.totalorder %v1511_v50, 16  ;;  %vm1514_vm6 = vcmp.ge.s32.totalorder %v1511_v50, 16  ;;  %v1539_v49 = vld [vmem:[#allocation4 + $0x18] sm:$0xff]  ;;  %v1537_v58 = vld [vmem:[#allocation4 + $0x8] sm:$0xff]  ;;  %v1540_v61 = vld [vmem:[#allocation4 + $0x20] sm:$0xff] }
 0x545   : > { %2962 = vrcp.f32 %v1553_v9  ;;  %vm1521_vm5 = vmand %vm1513_vm3, %vm1517_vm4  ;;  %vm1518_vm7 = vcmp.lt.s32.totalorder %v1511_v50, 24  ;;  %vm1516_vm8 = vcmp.lt.s32.totalorder %v1511_v50, 8  ;;  %vm1515_vm9 = vcmp.ge.s32.totalorder %v1511_v50, 24  ;;  %v1543_v3 = vld [vmem:[#allocation4 + $0x38] sm:$0xff]  ;;  %v1542_v8 = vld [vmem:[#allocation4 + $0x30] sm:$0xff] }
 0x546   : > { %2964 = vrcp.f32 %v1557_v10  ;;  %vm1519_vm10 = vcmp.lt.s32.totalorder %v1511_v50, 32  ;;  %vm1522_vm11 = vmand %vm1514_vm6, %vm1518_vm7  ;;  %v3531_v52 = vsel %vm1516_vm8, 1.0, %v3060_v41 }
 0x547   : > { %2966 = vrcp.f32 %v1556_v30  ;;  %vm1523_vm12 = vmand %vm1515_vm9, %vm1519_vm10  ;;  %v3535_v25 = vsel %vm1522_vm11, 1.0, %v3060_v41  ;;  %v1541_v2 = vld [vmem:[#allocation4 + $0x28] sm:$0xff]  ;;  %v1544_v29 = vmul.f32 %v3531_v52, %v1536_v22  ;;  %v1545_v4 = vmul.f32 %v3531_v52, %v1537_v58  ;;  %v3579_v58 = vld [vmem:[%s3760_s8] sm:$0xff]  }
 0x548   : > { %2968 = vrcp.f32 %v1559_v37  ;;  %v3541_v6 = vsel %vm1523_vm12, 1.0, %v3060_v41  ;;  %v1549_v7 = vmul.f32 %v3535_v25, %v1541_v2  ;;  %v1548_v38 = vmul.f32 %v3535_v25, %v1540_v61 }
 0x549   : > { %2970 = vrcp.f32 %v1558_v39  ;;  %v1551_v12 = vmul.f32 %v3541_v6, %v1543_v3  ;;  %v1550_v17 = vmul.f32 %v3541_v6, %v1542_v8  ;;  %v1625_v37 = vsub.s32 3, %v3344_v54 }
 0x54a   : > { %v1798_v22 = vsub.s32 7, %v3344_v54 }
 0x54b   : > { %v1626_v39 = vrot.slane %v3148_v0, %v1625_v37 }
 0x54f   : > { %v2957_v13 = vpop.eup %2956 }
 0x550   : > { %v2959_v43 = vpop.eup %2958  ;;  %1580 = vperm.xlu1 %2947, %v2957_v13  }
 0x551   : > { %v2961_v16 = vpop.eup %2960  ;;  %1570 = vperm.xlu0 %2946, %v2959_v43   ;;  %v1532_v43 = vld [vmem:[%s3753_s1] sm:$0xff] }
 0x552   : > { %v2963_v14 = vpop.eup %2962 }
 0x553   : > { %v2965_v44 = vpop.eup %2964 }
 0x554   : > { %1585 = vperm.xlu1 %2947, %v2961_v16   ;;  %v2967_v24 = vpop.eup %2966 }
 0x555   : > { %1575 = vperm.xlu0 %2946, %v2963_v14   ;;  %v2969_v45 = vpop.eup %2968 }
 0x556   : > { %v2971_v19 = vpop.eup %2970 }
 0x558   : > { %1595 = vperm.xlu1 %2947, %v2965_v44  }
 0x559   : > { %1590 = vperm.xlu0 %2946, %v2967_v24  }
 0x55c   : > { %1605 = vperm.xlu1 %2947, %v2969_v45   ;;  %v1533_v45 = vld [vmem:[%s3753_s1 + $0x8] sm:$0xff] }
 0x55d   : > { %1600 = vperm.xlu0 %2946, %v2971_v19  }
 0x560   : > { %1627 = vrot.lane.b32.xlu1 %v3243_v47, %s3061_s14  ;;  %v1538_v47 = vld [vmem:[#allocation4 + $0x10] sm:$0xff] }
 0x561   : > { %1629 = vrot.lane.b32.xlu0 %v3238_v46, %s3061_s14  ;;  %v3528_v46 = vsel %vm1521_vm5, 1.0, %v3060_v41 }
 0x562   : > { %v1546_v26 = vmul.f32 %v3528_v46, %v1538_v47  ;;  %v1547_v57 = vmul.f32 %v3528_v46, %v1539_v49  ;;  %v1799_v49 = vrot.slane %v3148_v0, %v1798_v22 }
 0x5cb   : > { %v1581_v51 = vpop.permute.xlu1 %1580 }
 0x5cc   : > { %v1571_v23 = vpop.permute.xlu0 %1570  ;;  %v1610_v56 = vmul.f32 %v1581_v51, %v1546_v26 }
 0x5cd   : > { %v1608_v18 = vmul.f32 %v1571_v23, %v1544_v29 }
 0x5cf   : > { %v1586_v53 = vpop.permute.xlu1 %1585  ;;  %v1616_v31 = vadd.f32 %v1610_v56, %v1608_v18 }
 0x5d0   : > { %v1576_v27 = vpop.permute.xlu0 %1575  ;;  %v1611_v63 = vmul.f32 %v1586_v53, %v1547_v57  ;;  %v3568_v53 = vld [vmem:[%s3760_s8 + $0x8] sm:$0xff]  }
 0x5d1   : > { %v1609_v55 = vmul.f32 %v1576_v27, %v1545_v4  ;;  %2794 = vmatpush3.bf16.msra.mxu1 %v3568_v53 }
 0x5d2   : > { %2795 = vmatprep.subr.bf16.mxu1 %v3060_v41 }
 0x5d3   : > { %v1596_v62 = vpop.permute.xlu1 %1595  ;;  %v1617_v32 = vadd.f32 %v1611_v63, %v1609_v55 }
 0x5d4   : > { %v1591_v5 = vpop.permute.xlu0 %1590  ;;  %v1613_v20 = vmul.f32 %v1596_v62, %v1549_v7 }
 0x5d5   : > { %v1612_v21 = vmul.f32 %v1591_v5, %v1548_v38  ;;  %2796 = vmatpush3.bf16.msra.mxu1 %v3579_v58 }
 0x5d6   : > { %v1619_v40 = vadd.f32 %v1617_v32, %v1613_v20 }
 0x5d7   : > { %v1606_v59 = vpop.permute.xlu1 %1605  ;;  %v1618_v34 = vadd.f32 %v1616_v31, %v1612_v21  ;;  %v1714_v21 = vsub.s32 5, %v3344_v54 }
 0x5d8   : > { %v1601_v28 = vpop.permute.xlu0 %1600  ;;  %v1615_v60 = vmul.f32 %v1606_v59, %v1551_v12  ;;  %v1708_v59 = vsub.s32 4, %v3344_v54 }
 0x5d9   : > { %v1614_v33 = vmul.f32 %v1601_v28, %v1550_v17 }
 0x5da   : > { %v1621_v36 = vadd.f32 %v1619_v40, %v1615_v60  ;;  %v1709_v20 = vrot.slane %v3148_v0, %v1708_v59  ;;  %v1715_v60 = vrot.slane %v3148_v0, %v1714_v21 }
 0x5db   : > { %v1620_v9 = vadd.f32 %v1618_v34, %v1614_v33  ;;  %v1628_v10 = vpop.permute.xlu1 %1627 }
 0x5dc   : > { %v1630_v35 = vpop.permute.xlu0 %1629 }
 0x5dd   : > { %2786 = vmatpush3.bf16.msra.mxu0 %v1630_v35  ;;  %v1622_v30 = vpack.c.bf16 %v1621_v36, %v1620_v9  ;;  %v1534_v36 = vld [vmem:[%s3755_s3] sm:$0xff]  ;;  %v1535_v9 = vld [vmem:[%s3755_s3 + $0x8] sm:$0xff] }
 0x5de   : > { %2787 = vmatprep.subr.bf16.mxu0 %v3060_v41 }
 0x5e1   : > { %2788 = vmatpush3.bf16.msra.mxu0 %v1628_v10 }
 0x5e2   : > { %2801 = vmatprep.subr.bf16.mxu0 %v3060_v41 }
 0x5e4   : > { %2790 = vmatmul.mubr.msk.bf16.vlgmr.msra.gmra.mxu0 %vm727_vm14, %v1622_v30 }
 0x5e5   : > { %2805 = vmatprep.mubr.msk.bf16.mxu0 %vm3062_vm2, %v3060_v41 }
 0x6a4   : > { %v1670_v13 = vpop.f32.mrf.mxu0 }
 0x6a5   : > { %v1671_v16 = vadd.f32 %v1670_v13, %v1626_v39 }
 0x6a6   : > { %v2791_v14 = vpop.f32.mrf.mxu0 }
 0x6a7   : > { %v1677_v44 = vadd.f32 %v1671_v16, %v1532_v43  ;;  %v1792_v16 = vsub.s32 6, %v3344_v54  ;;  %v1809_v14 = vsub.s32 0, %v3344_v54 }
 0x6a8   : > { %v1673_v24 = vpop.f32.mrf.mxu0 }
 0x6a9   : > { %v1674_v19 = vadd.f32 %v1673_v24, %v1626_v39  ;;  %v1679_v50 = vsel %vm727_vm14, %v1677_v44, 0.0  ;;  %v1793_v24 = vrot.slane %v3148_v0, %v1792_v16 }
 0x6aa   : > { %1680 = vadd.xlane.f32.xlu0 %v1679_v50  ;;  %v2792_v51 = vpop.f32.mrf.mxu0 }
 0x6ab   : > { %v1678_v23 = vadd.f32 %v1674_v19, %v1533_v45  ;;  %v1810_v45 = vrot.slane %v3153_v1, %v1809_v14 }
 0x6ad   : > { %v1682_v47 = vsel %vm727_vm14, %v1678_v23, 0.0 }
 0x6ae   : > { %1683 = vadd.xlane.f32.xlu1 %v1682_v47 }
 0x6bf   : > { %1801 = vrot.lane.b32.xlu1 %v1799_v49, %s3061_s14 }
 0x6c3   : > { %1813 = vrot.lane.b32.xlu1 %v3568_v53, %s3063_s28 }
 0x6c7   : > { %1811 = vrot.lane.b32.xlu1 %v3579_v58, %s3063_s28 }
 0x733   : > { %v1681_v27 = vpop.xlane.xlu0 %1680 }
 0x734   : > { %v1686_v26 = vmul.f32 0.03125, %v1681_v27 }
 0x736   : > { %v1688_v2 = vsub.f32 %v1677_v44, %v1686_v26 }
 0x737   : > { %v1684_v61 = vpop.xlane.xlu1 %1683 }
 0x738   : > { %v1687_v29 = vmul.f32 0.03125, %v1684_v61  ;;  %v1690_v57 = vmul.f32 %v1688_v2, %v1688_v2 }
 0x73a   : > { %v1689_v4 = vsub.f32 %v1678_v23, %v1687_v29  ;;  %v1692_v3 = vsel %vm727_vm14, %v1690_v57, 0.0 }
 0x73b   : > { %1693 = vadd.xlane.f32.xlu0 %v1692_v3  ;;  %v1802_v7 = vpop.permute.xlu1 %1801 }
 0x73c   : > { %v1691_v8 = vmul.f32 %v1689_v4, %v1689_v4 }
 0x73e   : > { %v1695_v62 = vsel %vm727_vm14, %v1691_v8, 0.0 }
 0x73f   : > { %1696 = vadd.xlane.f32.xlu0 %v1695_v62  ;;  %v1814_v5 = vpop.permute.xlu1 %1813 }
 0x740   : > { %2802 = vmatpush3.bf16.msra.mxu0 %v1814_v5 }
 0x741   : > { %2803 = vmatprep.subr.bf16.mxu0 %v3060_v41 }
 0x743   : > { %v1812_v38 = vpop.permute.xlu1 %1811 }
 0x744   : > { %2804 = vmatpush3.bf16.msra.mxu0 %v1812_v38 }
 0x7c4   : > { %v1694_v12 = vpop.xlane.xlu0 %1693 }
 0x7c5   : > { %v1698_v17 = vmul.f32 0.03125, %v1694_v12 }
 0x7c7   : > { %v1700_v56 = vadd.f32 1e-05, %v1698_v17 }
 0x7c8   : > { %v1697_v18 = vpop.xlane.xlu0 %1696 }
 0x7c9   : > { %2972 = vrsqrt.f32 %v1700_v56  ;;  %v1699_v63 = vmul.f32 0.03125, %v1697_v18 }
 0x7cb   : > { %v1701_v55 = vadd.f32 1e-05, %v1699_v63 }
 0x7cd   : > { %2974 = vrsqrt.f32 %v1701_v55 }
 0x7d6   : > { %v2973_v28 = vpop.eup %2972 }
 0x7d7   : > { %v1704_v31 = vmul.f32 %v2973_v28, %v1688_v2 }
 0x7d9   : > { %v1710_v32 = vmul.f32 %v1709_v20, %v1704_v31 }
 0x7da   : > { %v2975_v33 = vpop.eup %2974 }
 0x7db   : > { %v1705_v40 = vmul.f32 %v2975_v33, %v1689_v4  ;;  %v3595_v35 = vadd.f32 %v1715_v60, %v1710_v32  ;;  %v2578_v32 = vld [vmem:[%s3758_s6] ss:$0 sm:$0xff] }
 0x7dc   : > { %vm1723_vm13 = vcmp.ne.s32.totalorder %v3395_v11, %v2578_v32  ;;  %vm1724_vm15 = vcmp.ne.s32.totalorder %v3397_v15, %v2578_v32 }
 0x7dd   : > { %v1711_v34 = vmul.f32 %v1709_v20, %v1705_v40  ;;  %v1731_v39 = vadd.f32 %v3595_v35, %v1534_v36  ;;  %v1725_v33 = vsel %vm1723_vm13, -1e+09, %v3060_v41 }
 0x7df   : > { %v3603_v10 = vadd.f32 %v1715_v60, %v1711_v34 }
 0x7e1   : > { %v1806_v30 = vpack.c.bf16 %v3603_v10, %v3595_v35  ;;  %v1732_v13 = vadd.f32 %v3603_v10, %v1535_v9 }
 0x7e3   : > { %2806 = vmatmul.mubr.msk.bf16.vlgmr.msra.gmra.mxu0 %vm727_vm14, %v1806_v30  ;;  %v1733_v43 = vpack.c.bf16 %v1732_v13, %v1731_v39  ;;  %v1726_v39 = vsel %vm1724_vm15, -1e+09, %v3060_v41 }
 0x7e5   : > { %2798 = vmatmul.mubr.msk.bf16.vlgmr.msra.gmra.mxu1 %vm727_vm14, %v1733_v43 }
 0x8a3   : > { %v1854_v44 = vpop.f32.mrf.mxu0 }
 0x8a4   : > { %v1855_v49 = vadd.f32 %v1854_v44, %v1810_v45 }
 0x8a5   : > { %v1783_v19 = vpop.f32.mrf.mxu1  ;;  %v2807_v50 = vpop.f32.mrf.mxu0 }
 0x8a6   : > { %v1794_v51 = vadd.f32 %v1793_v24, %v1783_v19  ;;  %v1804_v61 = vadd.f32 %v1802_v7, %v1783_v19 }
 0x8a7   : > { %v2799_v23 = vpop.f32.mrf.mxu1  ;;  %v1857_v47 = vpop.f32.mrf.mxu0 }
 0x8a8   : > { %v1858_v27 = vadd.f32 %v1857_v47, %v1810_v45  ;;  %v1861_v8 = vmul.f32 %v3531_v52, %v1794_v51  ;;  %v1863_v0 = vmul.f32 %v3528_v46, %v1794_v51  ;;  %v1865_v62 = vmul.f32 %v3535_v25, %v1794_v51 }
 0x8a9   : > { %v1786_v26 = vpop.f32.mrf.mxu1  ;;  %v2808_v2 = vpop.f32.mrf.mxu0  ;;  %v1867_v56 = vmul.f32 %v3541_v6, %v1794_v51 }
 0x8aa   : > { %v2058_v29 = vpack.c.bf16 %v1858_v27, %v1855_v49  ;;  %v1795_v57 = vadd.f32 %v1793_v24, %v1786_v26  ;;  %v1805_v4 = vadd.f32 %v1802_v7, %v1786_v26 }
 0x8ab   : > { %v2800_v3 = vpop.f32.mrf.mxu1 }
 0x8ac   : > { %v1873_v5 = vpack.c.bf16 %v1805_v4, %v1804_v61  ;;  %2819 = vmatprep.subr.bf16.mxu0 %v2058_v29  ;;  %v1862_v38 = vmul.f32 %v3531_v52, %v1795_v57  ;;  %v1864_v12 = vmul.f32 %v3528_v46, %v1795_v57  ;;  %v1866_v17 = vmul.f32 %v3535_v25, %v1795_v57 }
 0x8ad   : > { %2820 = vmatpush3.bf16.msra.mxu0 %v2058_v29  ;;  %v1868_v7 = vmul.f32 %v3541_v6, %v1795_v57 }
 0x8ae   : > { %1875 = vrot.lane.b32.xlu0 %v1873_v5, %s3064_s27  ;;  %v1869_v18 = vpack.c.bf16 %v1862_v38, %v1861_v8  ;;  %v1870_v63 = vpack.c.bf16 %v1864_v12, %v1863_v0  ;;  %v1871_v55 = vpack.c.bf16 %v1866_v17, %v1865_v62  ;;  %2837 = vmatprep.subr.bf16.mxu0 %v3060_v41 }
 0x8af   : > { %v1872_v20 = vpack.c.bf16 %v1868_v7, %v1867_v56 }
 0x8b0   : > { %2811 = vmatprep.mubr.msk.bf16.mxu1 %vm727_vm14, %v1869_v18 }
 0x920   : > { %v1876_v28 = vpop.permute.xlu0 %1875 }
 0x921   : > { %v1890_v31 = vsel %vm727_vm14, %v1876_v28, 0  ;;  %2865 = vmatprep.subr.msk.bf16.mxu1 %vm727_vm14, %v1876_v28 }
 0x922   : > { %2810 = vmatpush3.bf16.xpose.msra.mxu1 %v1890_v31 }
 0x923   : > { %2829 = vmatprep.subr.bf16.mxu1 %v3060_v41 }
 0x929   : > { %2812 = vmatmul.mubr.msk.bf16.vlgmr.msra.gmra.mxu1 %vm727_vm14, %v1870_v63 }
 0x92a   : > { %2815 = vmatprep.mubr.msk.bf16.mxu1 %vm727_vm14, %v1871_v55 }
 0x931   : > { %2816 = vmatmul.mubr.msk.bf16.gmra.mxu1 %vm727_vm14, %v1872_v20 }
 0x932   : > { %2833 = vmatprep.mubr.msk.bf16.mxu1 %vm3062_vm2, %v3060_v41 }
 0x9e9   : > { %v2813_v60 = vpop.f32.mrf.mxu1 }
 0x9ea   : > { %v1959_v9 = vadd.f32 %v2813_v60, %v1725_v33 }
 0x9eb   : > { %v1926_v40 = vpop.f32.mrf.mxu1 }
 0x9ec   : > { %v1957_v34 = vadd.f32 %v1926_v40, %v1725_v33  ;;  %v1972_v11 = vsel %vm1965_vm0, %v1959_v9, -inf }
 0x9ed   : > { %v2814_v36 = vpop.f32.mrf.mxu1 }
 0x9ee   : > { %v1966_v30 = vsel %vm1965_vm0, %v1957_v34, -inf  ;;  %v1960_v44 = vadd.f32 %v2814_v36, %v1726_v39 }
 0x9ef   : > { %1967 = vmax.xlane.f32.xlu0 %v1966_v30  ;;  %v1929_v13 = vpop.f32.mrf.mxu1 }
 0x9f0   : > { %v1958_v43 = vadd.f32 %v1929_v13, %v1726_v39  ;;  %v1975_v51 = vsel %vm1965_vm0, %v1960_v44, -inf }
 0x9f1   : > { %v2817_v14 = vpop.f32.mrf.mxu1 }
 0x9f2   : > { %v1969_v24 = vsel %vm1965_vm0, %v1958_v43, -inf  ;;  %v1963_v50 = vadd.f32 %v2817_v14, %v1725_v33 }
 0x9f3   : > { %1973 = vmax.xlane.f32.xlu0 %v1972_v11  ;;  %1970 = vmax.xlane.f32.xlu1 %v1969_v24  ;;  %v1942_v45 = vpop.f32.mrf.mxu1 }
 0x9f4   : > { %v1961_v15 = vadd.f32 %v1942_v45, %v1725_v33  ;;  %v1984_v26 = vsel %vm1965_vm0, %v1963_v50, -inf }
 0x9f5   : > { %v2818_v19 = vpop.f32.mrf.mxu1 }
 0x9f6   : > { %v1978_v23 = vsel %vm1965_vm0, %v1961_v15, -inf  ;;  %v1964_v27 = vadd.f32 %v2818_v19, %v1726_v39 }
 0x9f7   : > { %1976 = vmax.xlane.f32.xlu0 %v1975_v51  ;;  %1979 = vmax.xlane.f32.xlu1 %v1978_v23  ;;  %v1945_v47 = vpop.f32.mrf.mxu1 }
 0x9f8   : > { %v1962_v49 = vadd.f32 %v1945_v47, %v1726_v39  ;;  %v1987_v61 = vsel %vm1965_vm0, %v1964_v27, -inf }
 0x9fa   : > { %v1981_v2 = vsel %vm1965_vm0, %v1962_v49, -inf }
 0x9fb   : > { %1985 = vmax.xlane.f32.xlu1 %v1984_v26  ;;  %1982 = vmax.xlane.f32.xlu0 %v1981_v2 }
 0x9ff   : > { %1988 = vmax.xlane.f32.xlu0 %v1987_v61 }
 0xa78   : > { %v1968_v29 = vpop.xlane.xlu0 %1967 }
 0xa79   : > { %v1990_v57 = vsub.f32 %v1957_v34, %v1968_v29 }
 0xa7b   : > { %v1998_v4 = vmul.f32 1.442695, %v1990_v57 }
 0xa7c   : > { %v1974_v3 = vpop.xlane.xlu0 %1973  ;;  %v1971_v8 = vpop.xlane.xlu1 %1970 }
 0xa7d   : > { %2976 = vpow2.f32 %v1998_v4  ;;  %v1992_v0 = vsub.f32 %v1959_v9, %v1974_v3  ;;  %v1991_v62 = vsub.f32 %v1958_v43, %v1971_v8 }
 0xa7f   : > { %v2002_v5 = vmul.f32 1.442695, %v1992_v0  ;;  %v2000_v38 = vmul.f32 1.442695, %v1991_v62 }
 0xa80   : > { %v1977_v12 = vpop.xlane.xlu0 %1976  ;;  %v1980_v17 = vpop.xlane.xlu1 %1979 }
 0xa81   : > { %2978 = vpow2.f32 %v2002_v5  ;;  %v1993_v56 = vsub.f32 %v1960_v44, %v1977_v12  ;;  %v1994_v7 = vsub.f32 %v1961_v15, %v1980_v17 }
 0xa82   : > { %2980 = vpow2.f32 %v2000_v38 }
 0xa83   : > { %v2004_v18 = vmul.f32 1.442695, %v1993_v56  ;;  %v2006_v63 = vmul.f32 1.442695, %v1994_v7 }
 0xa84   : > { %v1983_v55 = vpop.xlane.xlu0 %1982  ;;  %v1986_v20 = vpop.xlane.xlu1 %1985 }
 0xa85   : > { %2982 = vpow2.f32 %v2004_v18  ;;  %v1995_v28 = vsub.f32 %v1962_v49, %v1983_v55  ;;  %v1996_v31 = vsub.f32 %v1963_v50, %v1986_v20 }
 0xa86   : > { %2984 = vpow2.f32 %v2006_v63 }
 0xa87   : > { %v2008_v32 = vmul.f32 1.442695, %v1995_v28  ;;  %v2010_v60 = vmul.f32 1.442695, %v1996_v31 }
 0xa88   : > { %v1989_v33 = vpop.xlane.xlu0 %1988 }
 0xa89   : > { %2986 = vpow2.f32 %v2008_v32  ;;  %v1997_v40 = vsub.f32 %v1964_v27, %v1989_v33 }
 0xa8a   : > { %v2977_v34 = vpop.eup %2976  ;;  %2988 = vpow2.f32 %v2010_v60 }
 0xa8b   : > { %v2012_v36 = vmul.f32 1.442695, %v1997_v40  ;;  %v2014_v9 = vsel %vm1965_vm0, %v2977_v34, 0.0 }
 0xa8c   : > { %2015 = vadd.xlane.f32.xlu1 %v2014_v9 }
 0xa8d   : > { %2990 = vpow2.f32 %v2012_v36 }
 0xa8e   : > { %v2979_v30 = vpop.eup %2978 }
 0xa8f   : > { %v2981_v39 = vpop.eup %2980  ;;  %v2020_v13 = vsel %vm1965_vm0, %v2979_v30, 0.0 }
 0xa90   : > { %2021 = vadd.xlane.f32.xlu1 %v2020_v13  ;;  %v2017_v43 = vsel %vm1965_vm0, %v2981_v39, 0.0 }
 0xa91   : > { %2018 = vadd.xlane.f32.xlu0 %v2017_v43 }
 0xa92   : > { %v2983_v14 = vpop.eup %2982 }
 0xa93   : > { %v2985_v44 = vpop.eup %2984  ;;  %v2023_v11 = vsel %vm1965_vm0, %v2983_v14, 0.0 }
 0xa94   : > { %v2026_v24 = vsel %vm1965_vm0, %v2985_v44, 0.0 }
 0xa95   : > { %2024 = vadd.xlane.f32.xlu0 %v2023_v11  ;;  %2027 = vadd.xlane.f32.xlu1 %v2026_v24 }
 0xa96   : > { %v2987_v45 = vpop.eup %2986 }
 0xa97   : > { %v2989_v15 = vpop.eup %2988  ;;  %v2029_v19 = vsel %vm1965_vm0, %v2987_v45, 0.0 }
 0xa98   : > { %v2032_v50 = vsel %vm1965_vm0, %v2989_v15, 0.0 }
 0xa99   : > { %2030 = vadd.xlane.f32.xlu0 %v2029_v19  ;;  %2033 = vadd.xlane.f32.xlu1 %v2032_v50 }
 0xa9a   : > { %v2991_v51 = vpop.eup %2990 }
 0xa9b   : > { %v2035_v23 = vsel %vm1965_vm0, %v2991_v51, 0.0 }
 0xa9d   : > { %2036 = vadd.xlane.f32.xlu0 %v2035_v23 }
 0xaaa   : > { %2157 = vrot.lane.b32.xlu1 %v3568_v53, %s3061_s14 }
 0xab3   : > { %2155 = vrot.lane.b32.xlu0 %v3579_v58, %s3061_s14 }
 0xb15   : > { %v2016_v47 = vpop.xlane.xlu1 %2015 }
 0xb16   : > { %2992 = vrcp.f32 %v2016_v47 }
 0xb19   : > { %v2022_v49 = vpop.xlane.xlu1 %2021 }
 0xb1a   : > { %v2019_v27 = vpop.xlane.xlu0 %2018 }
 0xb1b   : > { %2994 = vrcp.f32 %v2019_v27 }
 0xb1c   : > { %2996 = vrcp.f32 %v2022_v49 }
 0xb1e   : > { %v2025_v26 = vpop.xlane.xlu0 %2024  ;;  %v2028_v2 = vpop.xlane.xlu1 %2027 }
 0xb1f   : > { %2998 = vrcp.f32 %v2025_v26 }
 0xb20   : > { %3000 = vrcp.f32 %v2028_v2 }
 0xb22   : > { %v2031_v61 = vpop.xlane.xlu0 %2030  ;;  %v2034_v29 = vpop.xlane.xlu1 %2033 }
 0xb23   : > { %3002 = vrcp.f32 %v2031_v61  ;;  %v2993_v57 = vpop.eup %2992 }
 0xb24   : > { %3004 = vrcp.f32 %v2034_v29  ;;  %v2046_v3 = vmul.f32 %v2993_v57, %v2977_v34 }
 0xb26   : > { %v2037_v4 = vpop.xlane.xlu0 %2036  ;;  %v2158_v60 = vpop.permute.xlu1 %2157 }
 0xb27   : > { %3006 = vrcp.f32 %v2037_v4  ;;  %2830 = vmatpush3.bf16.msra.mxu1 %v2158_v60 }
 0xb28   : > { %v2995_v53 = vpop.eup %2994  ;;  %2831 = vmatprep.subr.bf16.mxu1 %v3060_v41 }
 0xb29   : > { %v2047_v58 = vmul.f32 %v2995_v53, %v2981_v39  ;;  %v2997_v8 = vpop.eup %2996 }
 0xb2a   : > { %v2048_v5 = vmul.f32 %v2997_v8, %v2979_v30  ;;  %v2156_v33 = vpop.permute.xlu0 %2155 }
 0xb2b   : > { %v2054_v0 = vpack.c.bf16 %v2047_v58, %v2046_v3  ;;  %2832 = vmatpush3.bf16.msra.mxu1 %v2156_v33 }
 0xb2c   : > { %v2999_v62 = vpop.eup %2998  ;;  %2845 = vmatprep.subr.bf16.mxu1 %v3060_v41 }
 0xb2d   : > { %2821 = vmatprep.mubr.msk.bf16.mxu0 %vm1965_vm0, %v2054_v0  ;;  %v2049_v38 = vmul.f32 %v2999_v62, %v2983_v14  ;;  %v3001_v12 = vpop.eup %3000 }
 0xb2e   : > { %v2050_v7 = vmul.f32 %v3001_v12, %v2985_v44 }
 0xb2f   : > { %v2055_v17 = vpack.c.bf16 %v2049_v38, %v2048_v5 }
 0xb30   : > { %v3003_v56 = vpop.eup %3002 }
 0xb31   : > { %2822 = vmatmul.mubr.msk.bf16.vlgmr.msra.gmra.mxu0 %vm1965_vm0, %v2055_v17  ;;  %v2051_v18 = vmul.f32 %v3003_v56, %v2987_v45  ;;  %v3005_v63 = vpop.eup %3004 }
 0xb32   : > { %v2052_v28 = vmul.f32 %v3005_v63, %v2989_v15 }
 0xb33   : > { %v2056_v55 = vpack.c.bf16 %v2051_v18, %v2050_v7  ;;  %v2951_v7 = vld [vmem:[%s3761_s9] sm:$0xff]   ;;  %v2952_v18 = vld [vmem:[%s3762_s10 + $0x18] sm:$0xff]  }
 0xb34   : > { %v3007_v20 = vpop.eup %3006 }
 0xb35   : > { %2825 = vmatprep.mubr.msk.bf16.mxu0 %vm1965_vm0, %v2056_v55  ;;  %v2053_v31 = vmul.f32 %v3007_v20, %v2991_v51 }
 0xb37   : > { %v2057_v32 = vpack.c.bf16 %v2053_v31, %v2052_v28 }
 0xb39   : > { %2826 = vmatmul.mubr.msk.bf16.gmra.mxu0 %vm1965_vm0, %v2057_v32 }
 0xb3a   : > { %2841 = vmatprep.mubr.msk.bf16.mxu0 %vm3062_vm2, %v3060_v41 }
 0xbf1   : > { %v2823_v40 = vpop.f32.mrf.mxu0 }
 0xbf2   : > { %v2138_v43 = vmul.f32 %v2823_v40, %v3528_v46  ;;  %v2236_v40 = vrot.slane %v3153_v1, %v851_v42  ;;  %v2954_v42 = vld [vmem:[%s3762_s10 + $0x8] sm:$0xff]  }
 0xbf3   : > { %v2105_v34 = vpop.f32.mrf.mxu0 }
 0xbf4   : > { %v2136_v39 = vmul.f32 %v3531_v52, %v2105_v34 }
 0xbf5   : > { %v2824_v36 = vpop.f32.mrf.mxu0 }
 0xbf6   : > { %v2144_v24 = vadd.f32 %v2138_v43, %v2136_v39  ;;  %v2139_v45 = vmul.f32 %v2824_v36, %v3528_v46  ;;  %v2154_v46 = vrot.slane %v3153_v1, %v669_v48  ;;  %v2242_v36 = vrot.slane %v3153_v1, %v1625_v37  ;;  %v2955_v37 = vld [vmem:[%s3762_s10] sm:$0xff]  }
 0xbf7   : > { %v2108_v9 = vpop.f32.mrf.mxu0 }
 0xbf8   : > { %v2137_v14 = vmul.f32 %v3531_v52, %v2108_v9 }
 0xbf9   : > { %v2827_v30 = vpop.f32.mrf.mxu0 }
 0xbfa   : > { %v2145_v19 = vadd.f32 %v2139_v45, %v2137_v14  ;;  %v2142_v23 = vmul.f32 %v2827_v30, %v3541_v6 }
 0xbfb   : > { %v2121_v13 = vpop.f32.mrf.mxu0 }
 0xbfc   : > { %v2140_v44 = vmul.f32 %v3535_v25, %v2121_v13 }
 0xbfd   : > { %v2828_v11 = vpop.f32.mrf.mxu0 }
 0xbfe   : > { %v2146_v50 = vadd.f32 %v2144_v24, %v2140_v44  ;;  %v2143_v47 = vmul.f32 %v2828_v11, %v3541_v6  ;;  %v2953_v44 = vld [vmem:[%s3762_s10 + $0x10] sm:$0xff]   ;;  %v2253_v11 = vrot.slane %v3153_v1, %v1798_v22 }
 0xbff   : > { %v2124_v15 = vpop.f32.mrf.mxu0 }
 0xc00   : > { %v2141_v51 = vmul.f32 %v3535_v25, %v2124_v15  ;;  %v2148_v27 = vadd.f32 %v2146_v50, %v2142_v23 }
 0xc02   : > { %v2147_v49 = vadd.f32 %v2145_v19, %v2141_v51 }
 0xc04   : > { %v2149_v26 = vadd.f32 %v2147_v49, %v2143_v47 }
 0xc06   : > { %v2150_v2 = vpack.c.bf16 %v2149_v26, %v2148_v27 }
 0xc08   : > { %2834 = vmatmul.mubr.msk.bf16.vlgmr.msra.gmra.mxu1 %vm727_vm14, %v2150_v2 }
 0xc09   : > { %2853 = vmatprep.mubr.msk.bf16.mxu1 %vm3062_vm2, %v3060_v41  ;;  %2846 = vmatpush3.bf16.msra.mxu1 %v2952_v18  ;;  %v2431_v18 = vrot.slane %v3153_v1, %v1792_v16 }
 0xc0a   : > { %2847 = vmatprep.subr.bf16.mxu1 %v3060_v41 }
 0xc0d   : > { %2848 = vmatpush3.bf16.msra.mxu1 %v2953_v44 }
 0xc0e   : > { %2849 = vmatprep.subr.bf16.mxu1 %v3060_v41 }
 0xc11   : > { %2850 = vmatpush3.bf16.msra.mxu1 %v2954_v42 }
 0xc12   : > { %2851 = vmatprep.subr.bf16.mxu1 %v3060_v41 }
 0xc15   : > { %2852 = vmatpush3.bf16.msra.mxu1 %v2955_v37 }
 0xcc8   : > { %v2198_v52 = vpop.f32.mrf.mxu1 }
 0xcc9   : > { %v2199_v61 = vadd.f32 %v2198_v52, %v2154_v46 }
 0xcca   : > { %v2835_v25 = vpop.f32.mrf.mxu1 }
 0xccb   : > { %v2205_v29 = vadd.f32 %v2199_v61, %v3595_v35 }
 0xccc   : > { %v2201_v57 = vpop.f32.mrf.mxu1 }
 0xccd   : > { %v2202_v6 = vadd.f32 %v2201_v57, %v2154_v46  ;;  %v2207_v4 = vsel %vm727_vm14, %v2205_v29, 0.0 }
 0xcce   : > { %2208 = vadd.xlane.f32.xlu1 %v2207_v4  ;;  %v2836_v53 = vpop.f32.mrf.mxu1 }
 0xccf   : > { %v2206_v3 = vadd.f32 %v2202_v6, %v3603_v10  ;;  %v2950_v10 = vld [vmem:[%s3761_s9 + $0x8] sm:$0xff]  }
 0xcd0   : > { %2838 = vmatpush3.bf16.msra.mxu0 %v2950_v10  ;;  %v2425_v10 = vrot.slane %v3153_v1, %v1714_v21 }
 0xcd1   : > { %v2210_v58 = vsel %vm727_vm14, %v2206_v3, 0.0  ;;  %2839 = vmatprep.subr.bf16.mxu0 %v3060_v41  ;;  %v2324_v41 = vrot.slane %v3153_v1, %v1708_v59 }
 0xcd2   : > { %2211 = vadd.xlane.f32.xlu0 %v2210_v58 }
 0xcd4   : > { %2840 = vmatpush3.bf16.msra.mxu0 %v2951_v7 }
 0xd57   : > { %v2209_v8 = vpop.xlane.xlu1 %2208 }
 0xd58   : > { %v2213_v0 = vmul.f32 0.03125, %v2209_v8 }
 0xd5a   : > { %v2215_v62 = vsub.f32 %v2205_v29, %v2213_v0 }
 0xd5b   : > { %v2212_v48 = vpop.xlane.xlu0 %2211 }
 0xd5c   : > { %v2214_v5 = vmul.f32 0.03125, %v2212_v48  ;;  %v2217_v38 = vmul.f32 %v2215_v62, %v2215_v62 }
 0xd5e   : > { %v2216_v12 = vsub.f32 %v2206_v3, %v2214_v5  ;;  %v2219_v35 = vsel %vm727_vm14, %v2217_v38, 0.0 }
 0xd5f   : > { %2220 = vadd.xlane.f32.xlu1 %v2219_v35 }
 0xd60   : > { %v2218_v17 = vmul.f32 %v2216_v12, %v2216_v12 }
 0xd62   : > { %v2222_v56 = vsel %vm727_vm14, %v2218_v17, 0.0 }
 0xd63   : > { %2223 = vadd.xlane.f32.xlu0 %v2222_v56 }
 0xde8   : > { %v2221_v63 = vpop.xlane.xlu1 %2220 }
 0xde9   : > { %v2225_v55 = vmul.f32 0.03125, %v2221_v63 }
 0xdeb   : > { %v2227_v20 = vadd.f32 1e-05, %v2225_v55 }
 0xdec   : > { %v2224_v28 = vpop.xlane.xlu0 %2223 }
 0xded   : > { %3008 = vrsqrt.f32 %v2227_v20  ;;  %v2226_v31 = vmul.f32 0.03125, %v2224_v28 }
 0xdef   : > { %v2228_v32 = vadd.f32 1e-05, %v2226_v31 }
 0xdf1   : > { %3010 = vrsqrt.f32 %v2228_v32 }
 0xdfa   : > { %v3009_v60 = vpop.eup %3008 }
 0xdfb   : > { %v2231_v33 = vmul.f32 %v3009_v60, %v2215_v62 }
 0xdfd   : > { %v2237_v30 = vmul.f32 %v2236_v40, %v2231_v33 }
 0xdfe   : > { %v3011_v34 = vpop.eup %3010 }
 0xdff   : > { %v2232_v9 = vmul.f32 %v3011_v34, %v2216_v12  ;;  %v2243_v13 = vadd.f32 %v2242_v36, %v2237_v30 }
 0xe01   : > { %v2238_v39 = vmul.f32 %v2236_v40, %v2232_v9 }
 0xe03   : > { %v2244_v43 = vadd.f32 %v2242_v36, %v2238_v39 }
 0xe05   : > { %v2245_v14 = vpack.c.bf16 %v2244_v43, %v2243_v13 }
 0xe07   : > { %2842 = vmatmul.mubr.msk.bf16.vlgmr.msra.gmra.mxu0 %vm727_vm14, %v2245_v14 }
 0xec7   : > { %v2303_v24 = vpop.f32.mrf.mxu0 }
 0xec8   : > { %v2304_v15 = vadd.f32 %v2303_v24, %v2253_v11 }
 0xec9   : > { %v2843_v45 = vpop.f32.mrf.mxu0 }
 0xeca   : > { %v2310_v23 = vmax.f32 %v2304_v15, 0.0 }
 0xecb   : > { %v2306_v19 = vpop.f32.mrf.mxu0 }
 0xecc   : > { %v2307_v50 = vadd.f32 %v2306_v19, %v2253_v11 }
 0xecd   : > { %v2844_v51 = vpop.f32.mrf.mxu0 }
 0xece   : > { %v2311_v47 = vmax.f32 %v2307_v50, 0.0 }
 0xed0   : > { %v2312_v49 = vpack.c.bf16 %v2311_v47, %v2310_v23 }
 0xed2   : > { %2854 = vmatmul.mubr.msk.bf16.vlgmr.msra.gmra.mxu1 %vm2349_vm1, %v2312_v49 }
 0xf92   : > { %v2387_v27 = vpop.f32.mrf.mxu1 }
 0xf93   : > { %v2388_v26 = vadd.f32 %v2387_v27, %v2324_v41 }
 0xf94   : > { %v2855_v2 = vpop.f32.mrf.mxu1 }
 0xf95   : > { %v2394_v46 = vadd.f32 %v2388_v26, %v2243_v13 }
 0xf96   : > { %v2390_v22 = vpop.f32.mrf.mxu1 }
 0xf97   : > { %v2391_v52 = vadd.f32 %v2390_v22, %v2324_v41  ;;  %v2396_v61 = vsel %vm727_vm14, %v2394_v46, 0.0 }
 0xf98   : > { %2397 = vadd.xlane.f32.xlu1 %v2396_v61  ;;  %v2856_v25 = vpop.f32.mrf.mxu1 }
 0xf99   : > { %v2395_v29 = vadd.f32 %v2391_v52, %v2244_v43 }
 0xf9b   : > { %v2399_v57 = vsel %vm727_vm14, %v2395_v29, 0.0 }
 0xf9c   : > { %2400 = vadd.xlane.f32.xlu0 %v2399_v57 }
0x1021   : > { %v2398_v6 = vpop.xlane.xlu1 %2397 }
0x1022   : > { %v2402_v4 = vmul.f32 0.03125, %v2398_v6 }
0x1024   : > { %v2404_v53 = vsub.f32 %v2394_v46, %v2402_v4 }
0x1025   : > { %v2401_v3 = vpop.xlane.xlu0 %2400 }
0x1026   : > { %v2403_v58 = vmul.f32 0.03125, %v2401_v3  ;;  %v2406_v59 = vmul.f32 %v2404_v53, %v2404_v53 }
0x1028   : > { %v2405_v8 = vsub.f32 %v2395_v29, %v2403_v58  ;;  %v2408_v0 = vsel %vm727_vm14, %v2406_v59, 0.0 }
0x1029   : > { %2409 = vadd.xlane.f32.xlu1 %v2408_v0 }
0x102a   : > { %v2407_v62 = vmul.f32 %v2405_v8, %v2405_v8 }
0x102c   : > { %v2411_v48 = vsel %vm727_vm14, %v2407_v62, 0.0 }
0x102d   : > { %2412 = vadd.xlane.f32.xlu0 %v2411_v48 }
0x10b2   : > { %v2410_v5 = vpop.xlane.xlu1 %2409 }
0x10b3   : > { %v2414_v38 = vmul.f32 0.03125, %v2410_v5 }
0x10b5   : > { %v2416_v12 = vadd.f32 1e-05, %v2414_v38 }
0x10b6   : > { %v2413_v35 = vpop.xlane.xlu0 %2412 }
0x10b7   : > { %3012 = vrsqrt.f32 %v2416_v12  ;;  %v2415_v17 = vmul.f32 0.03125, %v2413_v35 }
0x10b9   : > { %v2417_v56 = vadd.f32 1e-05, %v2415_v17 }
0x10bb   : > { %3014 = vrsqrt.f32 %v2417_v56 }
0x10c4   : > { %v3013_v7 = vpop.eup %3012 }
0x10c5   : > { %v2420_v63 = vmul.f32 %v3013_v7, %v2404_v53 }
0x10c7   : > { %v2426_v55 = vmul.f32 %v2425_v10, %v2420_v63 }
0x10c8   : > { %v3015_v20 = vpop.eup %3014 }
0x10c9   : > { %v2432_v28 = vadd.f32 %v2431_v18, %v2426_v55  ;;  %v2421_v31 = vmul.f32 %v3015_v20, %v2405_v8 }
0x10cb   : > { %2434 = vst.msk [vmem:[#allocation6] sm:$0xff] %vm727_vm14, %v2432_v28  ;;  %v2427_v32 = vmul.f32 %v2425_v10, %v2421_v31 }
0x10cd   : > { %v2433_v60 = vadd.f32 %v2431_v18, %v2427_v32 }
0x10cf   : > { %2435 = vst.msk [vmem:[#allocation6 + $0x8] sm:$0xff] %vm727_vm14, %v2433_v60 }
0x10d0 PF: > { %p2870_p7 = scmp.eq.s32.totalorder %s3139_s22, 1  ;;  %s3065_s24 = smov [#allocation6]  }
0x10d1   : > { %s2442_s27 = sshll.u32 %s3065_s24, 4  ;;  %s2443_s27 = int_to_ptr.vmem [resolvable:$true] %s2442_s27 }
0x10d2   : > { %s3016_s15 = scalar_lea.vmem %s2443_s27, 256  ;;  %p3023_p11 = scmp.lt.s32.totalorder %s2443_s27, %s2443_s27 }
0x10d3   : > { %p3017_p8 = scmp.ne.s32.totalorder %s2443_s27, %s3016_s15  ;;  %p3024_p12 = scmp.lt.s32.totalorder %s3016_s15, %s3016_s15 }
0x10d5   : > { %p3018_p9 = pnand %p3017_p8, %p2870_p7  ;;  %p3025_p13 = por %p3024_p12, %p3023_p11 }
0x10d7   : > { %p3019_p10 = pneg %p3018_p9 }
0x10d9   : > { %p3026_p0 = pnand %p3025_p13, %p3019_p10 }
0x10db   : > { %3029 = shalt.err (!%p3026_p0)
}
0x10dc   : > { %s3066_s17 = smov 128   ;;  %s3067_s14 = smov 8  }
0x10dd   : > { %2867 = dma.vmem_to_hbm [thread:$0]  (%p2870_p7), %s2443_s27, 256, %s3764_s12, [#allocation7], %s3066_s17, %s3066_s17, %s3067_s14  }
0x10de   : > { %3045 = dma.done.wait (%p2870_p7), [#allocation7], 256  }
0x10df   : > { %3047 = vsyncadd (%p2870_p7), [#allocation7], 4294967040 }
0x10e0 PF: > { %s23_s21 = sadd.s32 1, %s3050_s21  }
0x10e1   : > { %p20_p1 = scmp.ge.s32.totalorder %s23_s21, 4  }
0x10e3   :  { %22 = sbr.rel (!%p20_p1) target bundleno = 1 (0x1), region = 109 }
0x10e8   :  { %2458 = vsyncpa [#allocation7], 1 }
0x10e9   :  { %2460 = vsyncpa [#allocation7 + $0x1], 1 }

</bundles_post_ra>
